<compile_context>
chip_gen: v5e
topology: v5e:2x2
jax: 0.10.0
libtpu: 0.0.40
codegen_flags: <defaults>
</compile_context>

<pallas_src>
import jax
import jax.numpy as jnp
from jax import lax
from jax.experimental import pallas as pl
from jax.experimental.pallas import tpu as pltpu

EPS = 1e-6


def _coord_attention_kernel(msgs_ref, adj_ref, projq_ref, projk_ref, wa_ref, out_ref):
    # Block shapes:
    #   msgs_ref  [1, TI, N, P]   adj_ref  [1, TI, N]
    #   projq_ref [1, 3, TI, P]   projk_ref [1, 3, P, N]
    #   wa_ref    [S, P]          out_ref  [1, 3, S, TI]
    # Hot tensors are carried as [TI, P, N]: neighbour axis N on lanes.

    # One in-VMEM relayout: [TI, N, P] -> [TI, P, N]; upcast after the (possibly
    # bf16) transpose so the relayout moves half the bytes for bf16 messages.
    msgs = jnp.transpose(msgs_ref[0], (0, 2, 1)).astype(jnp.float32)      # [TI, P, N]
    adj = adj_ref[0].astype(jnp.float32)                                  # [TI, N]

    # Softmax over neighbours with a multiplicative 0/1 adjacency gate
    # (rows with no neighbours fall back to an ungated softmax, like the ref).
    row_has = jnp.sum(adj, axis=-1, keepdims=True) > 0.0                  # [TI, 1]
    gate = jnp.where(row_has, adj, 1.0)[:, None, :]                       # [TI, 1, N]
    m_max = jnp.max(msgs, axis=-1, keepdims=True)                         # [TI, P, 1]
    e = jnp.exp(msgs - m_max) * gate                                      # [TI, P, N]
    # exact divide only on the small [TI, P, 1] denominator, broadcast multiply after
    attn = e * (1.0 / jnp.sum(e, axis=-1, keepdims=True))                 # [TI, P, N]
    w = jnp.sqrt(jnp.sum(attn * attn, axis=-1))                           # [TI, P]

    # Pairwise projected-coordinate differences, neighbour axis on lanes.
    pqx = projq_ref[0, 0]                                                 # [TI, P]
    pqy = projq_ref[0, 1]
    pqz = projq_ref[0, 2]
    pkx = projk_ref[0, 0]                                                 # [P, N]
    pky = projk_ref[0, 1]
    pkz = projk_ref[0, 2]
    vx = pqx[:, :, None] - pkx[None, :, :]                                # [TI, P, N]
    vy = pqy[:, :, None] - pky[None, :, :]
    vz = pqz[:, :, None] - pkz[None, :, :]
    # Single EUP rsqrt; eps folded into the radicand (|v|^2 + eps^2 vs the
    # reference 1/(|v| + eps)) -- covered by the test tolerance below.
    pa = attn * lax.rsqrt(vx * vx + vy * vy + vz * vz + EPS * EPS)        # [TI, P, N]
    ux = jnp.sum(vx * pa, axis=-1) * w                                    # [TI, P]
    uy = jnp.sum(vy * pa, axis=-1) * w
    uz = jnp.sum(vz * pa, axis=-1) * w

    # attn_proj (Linear P -> S) on the MXU; three lane-dense [S, TI] slab stores.
    wa = wa_ref[...]                                                      # [S, P]
    out_ref[0, 0] = jnp.dot(wa, ux.T, preferred_element_type=jnp.float32)
    out_ref[0, 1] = jnp.dot(wa, uy.T, preferred_element_type=jnp.float32)
    out_ref[0, 2] = jnp.dot(wa, uz.T, preferred_element_type=jnp.float32)


def _pick_tile(n, p, s, msg_itemsize, budget_bytes):
    """Query-row tile (TI, padded N).  Full N if its working set fits the soft
    budget (or N <= 128), otherwise the largest multiple of 128 that fits; the
    query axis is then padded to a multiple of TI (no full-N fallback)."""
    # ~10 live f32 [TI, P, N] temporaries dominate, plus the double-buffered
    # messages / adjacency / proj / output blocks.
    per_row = n * p * (10 * 4 + 2 * msg_itemsize) + 4 * n + 24 * s + 24 * p
    max_ti = max(1, budget_bytes // per_row)
    if n <= max_ti or n <= 128:
        return n, n
    ti = max(128, (max_ti // 128) * 128)
    n_pad = -(-n // ti) * ti
    return ti, n_pad


def coord_attention(coords, messages, adj, node_mask, wp, wa, set_weights):
    """coords [B,S,N,3], messages [B,N,N,P], adj [B,N,N], node_mask [B,S,N]
    -> updated coords [B,S,N,3] (matches CoordAttention.forward)."""
    B, S, N, _ = coords.shape
    P = wp.shape[0]

    # ---------- CoordNorm ('length') + coord_proj hoisted to XLA ----------
    coords_f = coords.astype(jnp.float32)
    mask = node_mask.astype(jnp.float32)
    mask3 = mask[..., None]                                               # [B,S,N,1]
    n_atoms = jnp.sum(mask, axis=-1, keepdims=True)                       # [B,S,1]
    com = jnp.sum(coords_f * mask3, axis=2, keepdims=True) / n_atoms[..., None]
    c = (coords_f - com) * mask3
    lengths = jnp.sqrt(jnp.sum(c * c, axis=-1))                           # [B,S,N]
    avg_len = jnp.sum(lengths, axis=2, keepdims=True) / n_atoms           # [B,S,1]
    c = c * set_weights.reshape(1, S, 1, 1).astype(jnp.float32) / (avg_len[..., None] + EPS)
    c = c * mask3
    proj = jnp.einsum('bsnd,ps->bdnp', c, wp.astype(jnp.float32))         # [B,3,N,P]
    proj_k = jnp.transpose(proj, (0, 1, 3, 2))                            # [B,3,P,N]

    # ---------- streamed inputs ----------
    msgs_k = messages if messages.dtype == jnp.bfloat16 else messages.astype(jnp.float32)
    adj_k = adj.astype(jnp.bfloat16)                                      # 0/1, exact in bf16

    # ---------- generation-aware VMEM budget & query-row tiling ----------
    try:
        vmem_cap = int(pltpu.get_tpu_info().vmem_capacity_bytes)
    except Exception:
        vmem_cap = 64 * 2 ** 20                                           # conservative default
    vmem_limit = int(min(vmem_cap * 5 // 8, 80 * 2 ** 20))                # ~40MiB v7x, ~80MiB v5e/v6e
    msg_item = jnp.dtype(msgs_k.dtype).itemsize
    fixed = 2 * (3 * P * N * 4) + 2 * (S * P * 4)                         # resident proj_k + weights
    tile_budget = max(vmem_limit - 8 * 2 ** 20 - fixed, 2 * 2 ** 20)
    tile_ni, n_pad = _pick_tile(N, P, S, msg_item, tile_budget)
    n_tiles = n_pad // tile_ni

    pad = n_pad - N
    proj_q = proj
    if pad:
        # Pad only the query-row axis: padded rows produce finite garbage that
        # is sliced off below; the neighbour axis stays exactly N, so padding
        # never enters the softmax / aggregation of real rows.
        msgs_k = jnp.pad(msgs_k, ((0, 0), (0, pad), (0, 0), (0, 0)))
        adj_k = jnp.pad(adj_k, ((0, 0), (0, pad), (0, 0)))
        proj_q = jnp.pad(proj, ((0, 0), (0, 0), (0, pad), (0, 0)))

    out_k = pl.pallas_call(
        _coord_attention_kernel,
        out_shape=jax.ShapeDtypeStruct((B, 3, S, n_pad), jnp.float32),
        grid_spec=pltpu.PrefetchScalarGridSpec(
            num_scalar_prefetch=0,
            grid=(B, n_tiles),
            in_specs=[
                pl.BlockSpec((1, tile_ni, N, P), lambda b, i: (b, i, 0, 0)),  # messages (native)
                pl.BlockSpec((1, tile_ni, N), lambda b, i: (b, i, 0)),        # adjacency
                pl.BlockSpec((1, 3, tile_ni, P), lambda b, i: (b, 0, i, 0)),  # proj, query rows
                pl.BlockSpec((1, 3, P, N), lambda b, i: (b, 0, 0, 0)),        # proj^T, neighbours
                pl.BlockSpec((S, P), lambda b, i: (0, 0)),                    # attn_proj.weight
            ],
            out_specs=pl.BlockSpec((1, 3, S, tile_ni), lambda b, i: (b, 0, 0, i)),
        ),
        compiler_params=pltpu.CompilerParams(
            dimension_semantics=("parallel", "parallel"),
            vmem_limit_bytes=vmem_limit,
        ),
    )(msgs_k, adj_k, proj_q, proj_k, wa.astype(jnp.float32))

    out_k = out_k[..., :N]                                                # drop padded query rows
    return jnp.transpose(out_k, (0, 2, 3, 1))                             # [B,S,N,3]


def coord_attention_ref(coords, messages, adj, node_mask, wp, wa, set_weights,
                        eps=EPS):
    """Plain-JAX mirror of the PyTorch forward (for verification)."""
    mask3 = node_mask[..., None]
    masked = coords * mask3
    n_atoms = node_mask.sum(axis=-1, keepdims=True)                 # [B,S,1]
    com = masked.sum(axis=2, keepdims=True) / n_atoms[..., None]    # [B,S,1,3]
    c = (coords - com) * mask3
    lengths = jnp.sqrt((c * c).sum(axis=-1))                        # [B,S,N]
    scaled = lengths.sum(axis=2, keepdims=True) / n_atoms           # [B,S,1]
    coord_div = scaled[..., None] + eps
    c = c * set_weights[None, :, None, None] / coord_div
    c = c * mask3
    x = jnp.transpose(c, (0, 3, 2, 1))                              # [B,3,N,S]
    proj = jnp.einsum('bdns,ps->bdnp', x, wp)
    vec = proj[:, :, :, None, :] - proj[:, :, None, :, :]           # [B,3,N,N,P]
    vlen = jnp.sqrt((vec * vec).sum(axis=1, keepdims=True))
    nd = vec / (vlen + eps)
    attn_mask = jnp.where(adj == 0, -jnp.inf, 0.0)
    attn_mask = jnp.where((adj.sum(-1) == 0)[..., None], 0.0, attn_mask)
    m = messages + attn_mask[..., None]
    attn = jax.nn.softmax(m, axis=2)
    upd = (nd * attn[:, None]).sum(axis=3)                          # [B,3,N,P]
    w = jnp.sqrt((attn ** 2).sum(axis=2))                           # [B,N,P]
    upd = upd * w[:, None]
    out = jnp.einsum('bdnp,sp->bdns', upd, wa)                      # [B,3,N,S]
    return jnp.transpose(out, (0, 3, 2, 1))                         # [B,S,N,3]


if __name__ == "__main__":
    key = jax.random.PRNGKey(0)
    B, S, N, P = 2, 4, 8, 4   # batch, n_coord_sets, n_nodes, proj_sets
    k1, k2, k3, k4, k5 = jax.random.split(key, 5)

    coords = jax.random.normal(k1, (B, S, N, 3), dtype=jnp.float32)
    messages = jax.random.normal(k2, (B, N, N, P), dtype=jnp.float32)
    adj = (jax.random.uniform(k3, (B, N, N)) > 0.4).astype(jnp.float32)
    node_mask = jnp.concatenate(
        [jnp.ones((B, S, N - 2)), jnp.zeros((B, S, 2))], axis=-1
    ).astype(jnp.float32)

    # Deterministic synthetic parameters (shapes from __init__).
    wp = jax.random.normal(k4, (P, S), dtype=jnp.float32) / jnp.sqrt(S)   # coord_proj.weight
    wa = jax.random.normal(k5, (S, P), dtype=jnp.float32) / jnp.sqrt(P)   # attn_proj.weight
    set_weights = jnp.ones((S,), dtype=jnp.float32)                       # CoordNorm.set_weights

    out = coord_attention(coords, messages, adj, node_mask, wp, wa, set_weights)
    out = jax.block_until_ready(out)

    ref = coord_attention_ref(coords, messages, adj, node_mask, wp, wa, set_weights)
    assert out.shape == (B, S, N, 3)
    max_err = float(jnp.max(jnp.abs(out - ref)))
    # Tolerance covers the rsqrt(|v|^2 + eps^2) vs 1/(|v| + eps) formulation.
    assert jnp.allclose(out, ref, atol=2e-3, rtol=2e-3), f"max abs err {max_err}"
    print("KERNEL_OK")
</pallas_src>

<mosaic_0001>
module attributes {stable_mosaic.version = 11 : i64} {
  func.func @_coord_attention_kernel(%arg0: i32, %arg1: i32, %arg2: memref<1x8x8x4xf32, #tpu.memory_space<vmem>>, %arg3: memref<1x8x8xbf16, #tpu.memory_space<vmem>>, %arg4: memref<1x3x8x4xf32, #tpu.memory_space<vmem>>, %arg5: memref<1x3x4x8xf32, #tpu.memory_space<vmem>>, %arg6: memref<4x4xf32, #tpu.memory_space<vmem>>, %arg7: memref<1x3x4x8xf32, #tpu.memory_space<vmem>>) attributes {dimension_semantics = [#tpu.dimension_semantics<parallel>, #tpu.dimension_semantics<parallel>], iteration_bounds = array<i64: 2, 1>, scalar_prefetch = 0 : i64, scratch_operands = 0 : i64, tpu.core_type = #tpu.core_type<tc>, window_params = [{transform_indices = @transform_0, window_bounds = array<i64: 1, 8, 8, 4>}, {transform_indices = @transform_1, window_bounds = array<i64: 1, 8, 8>}, {transform_indices = @transform_2, window_bounds = array<i64: 1, 3, 8, 4>}, {transform_indices = @transform_3, window_bounds = array<i64: 1, 3, 4, 8>}, {pipeline_mode = #tpu.pipeline_mode<synchronous>, transform_indices = @transform_4, window_bounds = array<i64: 4, 4>}, {transform_indices = @transform_5, window_bounds = array<i64: 1, 3, 4, 8>}]} {
    %c0 = arith.constant 0 : index
    %c0_0 = arith.constant 0 : index
    %c0_1 = arith.constant 0 : index
    %c0_2 = arith.constant 0 : index
    %0 = vector.load %arg2[%c0, %c0_0, %c0_1, %c0_2] : memref<1x8x8x4xf32, #tpu.memory_space<vmem>>, vector<1x8x8x4xf32>
    %1 = vector.shape_cast %0 : vector<1x8x8x4xf32> to vector<8x8x4xf32>
    %2 = tpu.transpose %1, [0, 2, 1] : vector<8x8x4xf32> -> vector<8x4x8xf32>
    %c0_3 = arith.constant 0 : index
    %c0_4 = arith.constant 0 : index
    %c0_5 = arith.constant 0 : index
    %3 = vector.load %arg3[%c0_3, %c0_4, %c0_5] : memref<1x8x8xbf16, #tpu.memory_space<vmem>>, vector<1x8x8xbf16>
    %4 = vector.shape_cast %3 : vector<1x8x8xbf16> to vector<8x8xbf16>
    %5 = arith.extf %4 : vector<8x8xbf16> to vector<8x8xf32>
    %cst = arith.constant dense<0.000000e+00> : vector<8xf32>
    %6 = vector.multi_reduction <add>, %5, %cst [1] : vector<8x8xf32> to vector<8xf32>
    %7 = vector.shape_cast %6 : vector<8xf32> to vector<8x1xf32>
    %cst_6 = arith.constant 0.000000e+00 : f32
    %8 = vector.broadcast %cst_6 : f32 to vector<8x1xf32>
    %9 = arith.cmpf ogt, %7, %8 : vector<8x1xf32>
    %cst_7 = arith.constant 1.000000e+00 : f32
    %10 = vector.shape_cast %9 : vector<8x1xi1> to vector<8x1xi1>
    %11 = vector.broadcast %10 : vector<8x1xi1> to vector<8x8xi1>
    %12 = vector.broadcast %cst_7 : f32 to vector<8x8xf32>
    %13 = arith.select %11, %5, %12 : vector<8x8xi1>, vector<8x8xf32>
    %14 = vector.shape_cast %13 : vector<8x8xf32> to vector<8x1x8xf32>
    %cst_8 = arith.constant dense<0xFF800000> : vector<8x4xf32>
    %15 = vector.multi_reduction <maximumf>, %2, %cst_8 [2] : vector<8x4x8xf32> to vector<8x4xf32>
    %16 = vector.shape_cast %15 : vector<8x4xf32> to vector<8x4x1xf32>
    %17 = vector.broadcast %16 : vector<8x4x1xf32> to vector<8x4x8xf32>
    %18 = arith.subf %2, %17 : vector<8x4x8xf32>
    %19 = math.exp %18 : vector<8x4x8xf32>
    %20 = vector.broadcast %14 : vector<8x1x8xf32> to vector<8x4x8xf32>
    %21 = arith.mulf %19, %20 : vector<8x4x8xf32>
    %cst_9 = arith.constant dense<0.000000e+00> : vector<8x4xf32>
    %22 = vector.multi_reduction <add>, %21, %cst_9 [2] : vector<8x4x8xf32> to vector<8x4xf32>
    %23 = vector.shape_cast %22 : vector<8x4xf32> to vector<8x4x1xf32>
    %cst_10 = arith.constant 1.000000e+00 : f32
    %24 = vector.broadcast %cst_10 : f32 to vector<8x4x1xf32>
    %25 = arith.divf %24, %23 : vector<8x4x1xf32>
    %26 = vector.broadcast %25 : vector<8x4x1xf32> to vector<8x4x8xf32>
    %27 = arith.mulf %21, %26 : vector<8x4x8xf32>
    %28 = arith.mulf %27, %27 : vector<8x4x8xf32>
    %cst_11 = arith.constant dense<0.000000e+00> : vector<8x4xf32>
    %29 = vector.multi_reduction <add>, %28, %cst_11 [2] : vector<8x4x8xf32> to vector<8x4xf32>
    %30 = math.sqrt %29 : vector<8x4xf32>
    %c0_12 = arith.constant 0 : index
    %c0_13 = arith.constant 0 : index
    %c0_14 = arith.constant 0 : index
    %c0_15 = arith.constant 0 : index
    %31 = vector.load %arg4[%c0_12, %c0_13, %c0_14, %c0_15] : memref<1x3x8x4xf32, #tpu.memory_space<vmem>>, vector<1x1x8x4xf32>
    %32 = vector.shape_cast %31 : vector<1x1x8x4xf32> to vector<8x4xf32>
    %c0_16 = arith.constant 0 : index
    %c1 = arith.constant 1 : index
    %c0_17 = arith.constant 0 : index
    %c0_18 = arith.constant 0 : index
    %33 = vector.load %arg4[%c0_16, %c1, %c0_17, %c0_18] : memref<1x3x8x4xf32, #tpu.memory_space<vmem>>, vector<1x1x8x4xf32>
    %34 = vector.shape_cast %33 : vector<1x1x8x4xf32> to vector<8x4xf32>
    %c0_19 = arith.constant 0 : index
    %c2 = arith.constant 2 : index
    %c0_20 = arith.constant 0 : index
    %c0_21 = arith.constant 0 : index
    %35 = vector.load %arg4[%c0_19, %c2, %c0_20, %c0_21] : memref<1x3x8x4xf32, #tpu.memory_space<vmem>>, vector<1x1x8x4xf32>
    %36 = vector.shape_cast %35 : vector<1x1x8x4xf32> to vector<8x4xf32>
    %c0_22 = arith.constant 0 : index
    %c0_23 = arith.constant 0 : index
    %c0_24 = arith.constant 0 : index
    %c0_25 = arith.constant 0 : index
    %37 = vector.load %arg5[%c0_22, %c0_23, %c0_24, %c0_25] : memref<1x3x4x8xf32, #tpu.memory_space<vmem>>, vector<1x1x4x8xf32>
    %38 = vector.shape_cast %37 : vector<1x1x4x8xf32> to vector<4x8xf32>
    %c0_26 = arith.constant 0 : index
    %c1_27 = arith.constant 1 : index
    %c0_28 = arith.constant 0 : index
    %c0_29 = arith.constant 0 : index
    %39 = vector.load %arg5[%c0_26, %c1_27, %c0_28, %c0_29] : memref<1x3x4x8xf32, #tpu.memory_space<vmem>>, vector<1x1x4x8xf32>
    %40 = vector.shape_cast %39 : vector<1x1x4x8xf32> to vector<4x8xf32>
    %c0_30 = arith.constant 0 : index
    %c2_31 = arith.constant 2 : index
    %c0_32 = arith.constant 0 : index
    %c0_33 = arith.constant 0 : index
    %41 = vector.load %arg5[%c0_30, %c2_31, %c0_32, %c0_33] : memref<1x3x4x8xf32, #tpu.memory_space<vmem>>, vector<1x1x4x8xf32>
    %42 = vector.shape_cast %41 : vector<1x1x4x8xf32> to vector<4x8xf32>
    %43 = vector.shape_cast %32 : vector<8x4xf32> to vector<8x4x1xf32>
    %44 = vector.shape_cast %38 : vector<4x8xf32> to vector<1x4x8xf32>
    %45 = vector.broadcast %43 : vector<8x4x1xf32> to vector<8x4x8xf32>
    %46 = vector.broadcast %44 : vector<1x4x8xf32> to vector<8x4x8xf32>
    %47 = arith.subf %45, %46 : vector<8x4x8xf32>
    %48 = vector.shape_cast %34 : vector<8x4xf32> to vector<8x4x1xf32>
    %49 = vector.shape_cast %40 : vector<4x8xf32> to vector<1x4x8xf32>
    %50 = vector.broadcast %48 : vector<8x4x1xf32> to vector<8x4x8xf32>
    %51 = vector.broadcast %49 : vector<1x4x8xf32> to vector<8x4x8xf32>
    %52 = arith.subf %50, %51 : vector<8x4x8xf32>
    %53 = vector.shape_cast %36 : vector<8x4xf32> to vector<8x4x1xf32>
    %54 = vector.shape_cast %42 : vector<4x8xf32> to vector<1x4x8xf32>
    %55 = vector.broadcast %53 : vector<8x4x1xf32> to vector<8x4x8xf32>
    %56 = vector.broadcast %54 : vector<1x4x8xf32> to vector<8x4x8xf32>
    %57 = arith.subf %55, %56 : vector<8x4x8xf32>
    %58 = arith.mulf %47, %47 : vector<8x4x8xf32>
    %59 = arith.mulf %52, %52 : vector<8x4x8xf32>
    %60 = arith.addf %58, %59 : vector<8x4x8xf32>
    %61 = arith.mulf %57, %57 : vector<8x4x8xf32>
    %62 = arith.addf %60, %61 : vector<8x4x8xf32>
    %cst_34 = arith.constant 9.99999996E-13 : f32
    %63 = vector.broadcast %cst_34 : f32 to vector<8x4x8xf32>
    %64 = arith.addf %62, %63 : vector<8x4x8xf32>
    %65 = math.rsqrt %64 : vector<8x4x8xf32>
    %66 = arith.mulf %27, %65 : vector<8x4x8xf32>
    %67 = arith.mulf %47, %66 : vector<8x4x8xf32>
    %cst_35 = arith.constant dense<0.000000e+00> : vector<8x4xf32>
    %68 = vector.multi_reduction <add>, %67, %cst_35 [2] : vector<8x4x8xf32> to vector<8x4xf32>
    %69 = arith.mulf %68, %30 : vector<8x4xf32>
    %70 = arith.mulf %52, %66 : vector<8x4x8xf32>
    %cst_36 = arith.constant dense<0.000000e+00> : vector<8x4xf32>
    %71 = vector.multi_reduction <add>, %70, %cst_36 [2] : vector<8x4x8xf32> to vector<8x4xf32>
    %72 = arith.mulf %71, %30 : vector<8x4xf32>
    %73 = arith.mulf %57, %66 : vector<8x4x8xf32>
    %cst_37 = arith.constant dense<0.000000e+00> : vector<8x4xf32>
    %74 = vector.multi_reduction <add>, %73, %cst_37 [2] : vector<8x4x8xf32> to vector<8x4xf32>
    %75 = arith.mulf %74, %30 : vector<8x4xf32>
    %c0_38 = arith.constant 0 : index
    %c0_39 = arith.constant 0 : index
    %76 = vector.load %arg6[%c0_38, %c0_39] : memref<4x4xf32, #tpu.memory_space<vmem>>, vector<4x4xf32>
    %77 = tpu.transpose %69, [1, 0] : vector<8x4xf32> -> vector<4x8xf32>
    %cst_40 = arith.constant dense<0.000000e+00> : vector<4x8xf32>
    %78 = tpu.matmul %76, %77, %cst_40 {dimension_numbers = #tpu.dot_dimension_numbers<[1], [0], [0], [1], [0, 0, 1, 1], [], []>} : vector<4x4xf32>, vector<4x8xf32>, vector<4x8xf32> -> vector<4x8xf32>
    %c0_41 = arith.constant 0 : index
    %c0_42 = arith.constant 0 : index
    %c0_43 = arith.constant 0 : index
    %c0_44 = arith.constant 0 : index
    %79 = vector.load %arg7[%c0_41, %c0_42, %c0_43, %c0_44] : memref<1x3x4x8xf32, #tpu.memory_space<vmem>>, vector<1x1x4x8xf32>
    %80 = vector.shape_cast %79 : vector<1x1x4x8xf32> to vector<4x8xf32>
    %81 = vector.shape_cast %78 : vector<4x8xf32> to vector<1x1x4x8xf32>
    tpu.vector_store %arg7[%c0_41, %c0_42, %c0_43, %c0_44], %81 {strides = array<i32>} : memref<1x3x4x8xf32, #tpu.memory_space<vmem>>, vector<1x1x4x8xf32>,
    %82 = tpu.transpose %72, [1, 0] : vector<8x4xf32> -> vector<4x8xf32>
    %cst_45 = arith.constant dense<0.000000e+00> : vector<4x8xf32>
    %83 = tpu.matmul %76, %82, %cst_45 {dimension_numbers = #tpu.dot_dimension_numbers<[1], [0], [0], [1], [0, 0, 1, 1], [], []>} : vector<4x4xf32>, vector<4x8xf32>, vector<4x8xf32> -> vector<4x8xf32>
    %c0_46 = arith.constant 0 : index
    %c1_47 = arith.constant 1 : index
    %c0_48 = arith.constant 0 : index
    %c0_49 = arith.constant 0 : index
    %84 = vector.load %arg7[%c0_46, %c1_47, %c0_48, %c0_49] : memref<1x3x4x8xf32, #tpu.memory_space<vmem>>, vector<1x1x4x8xf32>
    %85 = vector.shape_cast %84 : vector<1x1x4x8xf32> to vector<4x8xf32>
    %86 = vector.shape_cast %83 : vector<4x8xf32> to vector<1x1x4x8xf32>
    tpu.vector_store %arg7[%c0_46, %c1_47, %c0_48, %c0_49], %86 {strides = array<i32>} : memref<1x3x4x8xf32, #tpu.memory_space<vmem>>, vector<1x1x4x8xf32>,
    %87 = tpu.transpose %75, [1, 0] : vector<8x4xf32> -> vector<4x8xf32>
    %cst_50 = arith.constant dense<0.000000e+00> : vector<4x8xf32>
    %88 = tpu.matmul %76, %87, %cst_50 {dimension_numbers = #tpu.dot_dimension_numbers<[1], [0], [0], [1], [0, 0, 1, 1], [], []>} : vector<4x4xf32>, vector<4x8xf32>, vector<4x8xf32> -> vector<4x8xf32>
    %c0_51 = arith.constant 0 : index
    %c2_52 = arith.constant 2 : index
    %c0_53 = arith.constant 0 : index
    %c0_54 = arith.constant 0 : index
    %89 = vector.load %arg7[%c0_51, %c2_52, %c0_53, %c0_54] : memref<1x3x4x8xf32, #tpu.memory_space<vmem>>, vector<1x1x4x8xf32>
    %90 = vector.shape_cast %89 : vector<1x1x4x8xf32> to vector<4x8xf32>
    %91 = vector.shape_cast %88 : vector<4x8xf32> to vector<1x1x4x8xf32>
    tpu.vector_store %arg7[%c0_51, %c2_52, %c0_53, %c0_54], %91 {strides = array<i32>} : memref<1x3x4x8xf32, #tpu.memory_space<vmem>>, vector<1x1x4x8xf32>,
    return
  }
  func.func @transform_0(%arg0: i32, %arg1: i32) -> (i32, i32, i32, i32) {
    %c0_i32 = arith.constant 0 : i32
    %c0_i32_0 = arith.constant 0 : i32
    %c0_i32_1 = arith.constant 0 : i32
    return %arg0, %arg1, %c0_i32, %c0_i32_0 : i32, i32, i32, i32
  }
  func.func @transform_1(%arg0: i32, %arg1: i32) -> (i32, i32, i32) {
    %c0_i32 = arith.constant 0 : i32
    %c0_i32_0 = arith.constant 0 : i32
    return %arg0, %arg1, %c0_i32 : i32, i32, i32
  }
  func.func @transform_2(%arg0: i32, %arg1: i32) -> (i32, i32, i32, i32) {
    %c0_i32 = arith.constant 0 : i32
    %c0_i32_0 = arith.constant 0 : i32
    %c0_i32_1 = arith.constant 0 : i32
    return %arg0, %c0_i32, %arg1, %c0_i32_0 : i32, i32, i32, i32
  }
  func.func @transform_3(%arg0: i32, %arg1: i32) -> (i32, i32, i32, i32) {
    %c0_i32 = arith.constant 0 : i32
    %c0_i32_0 = arith.constant 0 : i32
    %c0_i32_1 = arith.constant 0 : i32
    %c0_i32_2 = arith.constant 0 : i32
    return %arg0, %c0_i32, %c0_i32_0, %c0_i32_1 : i32, i32, i32, i32
  }
  func.func @transform_4(%arg0: i32, %arg1: i32) -> (i32, i32) {
    %c0_i32 = arith.constant 0 : i32
    %c0_i32_0 = arith.constant 0 : i32
    %c0_i32_1 = arith.constant 0 : i32
    return %c0_i32, %c0_i32_0 : i32, i32
  }
  func.func @transform_5(%arg0: i32, %arg1: i32) -> (i32, i32, i32, i32) {
    %c0_i32 = arith.constant 0 : i32
    %c0_i32_0 = arith.constant 0 : i32
    %c0_i32_1 = arith.constant 0 : i32
    return %arg0, %c0_i32, %c0_i32_0, %arg1 : i32, i32, i32, i32
  }
}

</mosaic_0001>

<bundles_post_ra>
// kernel: tpu_custom_call.1
= control target key start
LH: loop header
LB: loop body
LE: loop exit
PB: predicated region body
PF: predicated region fallthrough
CT: control target
= control target key end

     0   :  { %10 = vsyncpa [#allocation3], 0  ;;  %s2768_s0 = inlined_call_operand.vmem [shape: f32[2,8,8,4], index: 0, kind: input, shape index: {}]   ;;  %s2769_s1 = inlined_call_operand.vmem [shape: bf16[2,8,8], index: 1, kind: input, shape index: {}]   ;;  %s2770_s2 = inlined_call_operand.vmem [shape: f32[2,3,8,4], index: 2, kind: input, shape index: {}]   ;;  %s2771_s3 = inlined_call_operand.vmem [shape: f32[2,3,4,8], index: 3, kind: input, shape index: {}]   ;;  %s2772_s4 = inlined_call_operand.vmem [shape: f32[4,4], index: 4, kind: input, shape index: {}]   ;;  %s2773_s5 = inlined_call_operand.hbm [shape: f32[2,3,4,8], index: 5, kind: output, shape index: {}]  }
   0x1   :  { %12 = vsyncpa [#allocation3 + $0x1], 0  ;;  %s1986_s18 = smov 0   ;;  %s1988_s19 = smov 0  }
   0x2   :  { %s1990_s20 = smov 0   ;;  %s1992_s21 = smov 0  }
   0x3   :  { %s1994_s22 = smov 0   ;;  %s1996_s23 = smov 0  }
   0x4 LB: > { %s1719_s24 = sadd.s32 4294967295, %s1952_s23   ;;  %s1720_s25 = sadd.s32 4294967294, %s1952_s23   ;;  %s1952_s23 = sphi %s1996_s23, %s18_s23   ;;  %s1948_s22 = sphi %s1994_s22, %s2788_s22   ;;  %s1944_s21 = sphi %s1992_s21, %s2787_s21   ;;  %s1940_s20 = sphi %s1990_s20, %s2786_s20   ;;  %s1936_s19 = sphi %s1988_s19, %s2785_s19   ;;  %s1932_s18 = sphi %s1986_s18, %s2784_s18  }
   0x5   : > { %s30_s26 = sadd.s32 1, %s1948_s22  ;;  %s170_s27 = sadd.s32 1, %s1940_s20 }
   0x6   : > { %p32_p0 = scmp.ge.s32.totalorder %s30_s26, 2  ;;  %p180_p1 = scmp.ne.s32.totalorder %s1940_s20, %s1936_s19 }
   0x7   : > { %p181_p2 = scmp.eq.s32.totalorder %s1719_s24, 1  ;;  %p186_p3 = scmp.ne.s32.totalorder %s1936_s19, %s1932_s18 }
   0x8   : > { %s2790_s26 = smov (%p32_p0, %s30_s26), 0  ;;  %p187_p5 = scmp.eq.s32.totalorder %s1720_s25, 1 }
   0x9   : > { %p2026_p4 = por %p181_p2, %p180_p1  ;;  %s165_s29 = ssub.s32 %s1948_s22, %s2790_s26 }
   0xa   : > { %p1723_p6 = scmp.ge.s32.totalorder %s1952_s23, 1  ;;  %p168_p7 = scmp.eq.s32.totalorder %s165_s29, 0 }
   0xb   : > { %p2033_p8 = por %p187_p5, %p186_p3  ;;  %p250_p9 = scmp.lt.s32.totalorder %s1952_s23, 3 }
   0xc   : > { %s2039_s6 = scalar_select %p168_p7, %s1940_s20, %s170_s27  }
   0xd   : > { %p251_p10 = pnand %p1723_p6, %p250_p9 }
   0xe   : > { %p303_p11 = scmp.lt.s32.totalorder (!%p251_p10), %s1944_s21, 1  ;;  %s1748_s14 = smul.u32 (!%p251_p10), 12, %s1944_s21 }
   0xf   : > { %254 = sbr.rel (%p251_p10) target bundleno = 883 (0x373), region = 40  ;;  %s1894_s9 = scalar_lea.hbm (!%p251_p10), %s2773_s5, 24 }
  0x10   : > { %s1592_s17 = scalar_lea.hbm (!%p251_p10), %s2773_s5, %s1748_s14 }
  0x14   : > { %s2043_s7 = scalar_select %p303_p11, %s1944_s21, 1  ;;  %vm598_vm0 = vcmask 64512   ;;  %vm614_vm1 = vcmask 60416   ;;  %v978_v27 = vlaneseq }
  0x16   : > { %s1744_s8 = sshll.u32 %s2043_s7, 6  ;;  %s1726_s12 = sshll.u32 %s2043_s7, 2  ;;  %v979_v28 = vshrl.u32 %v978_v27, 7 }
  0x17   : > { %s310_s11 = scalar_lea.vmem %s2768_s0, %s1744_s8  ;;  %s318_s15 = scalar_lea.vmem %s2769_s1, %s1726_s12 }
  0x18   : > { %v336_v0 = vld [vmem:[%s310_s11 + $0x20] sm:$0xff]  ;;  %v334_v1 = vld [vmem:[%s310_s11 + $0x10] sm:$0xff]  ;;  %v335_v3 = vld [vmem:[%s310_s11 + $0x18] sm:$0xff]  ;;  %s1746_s16 = smul.u32 24, %s2043_s7 }
  0x19   : > { %v332_v2 = vld [vmem:[%s310_s11] sm:$0xff]  ;;  %468 = vxpose.xlu2.b32.start.end [1/1] (short) (narrow) %v336_v0, 8  ;;  %404 = vxpose.xlu1.b32.start.end [1/1] (short) (narrow) %v334_v1, 8  ;;  %v337_v4 = vld [vmem:[%s310_s11 + $0x28] sm:$0xff]  ;;  %v339_v6 = vld [vmem:[%s310_s11 + $0x38] sm:$0xff]  ;;  %s1747_s27 = smul.u32 12, %s2043_s7 }
  0x1a   : > { %340 = vxpose.xlu0.b32.start.end [1/1] (short) (narrow) %v332_v2, 8  ;;  %v333_v5 = vld [vmem:[%s310_s11 + $0x8] sm:$0xff]  ;;  %v338_v7 = vld [vmem:[%s310_s11 + $0x30] sm:$0xff]  ;;  %v596_v8 = vld [vmem:[%s318_s15] sm:$0xf]  ;;  %s2075_s25 = scalar_lea.vmem %s2770_s2, %s1746_s16  ;;  %s299_s11 = sand.u32 1, %s1936_s19  }
  0x1b   : > { %v597_v9 = vunpack.c.l.bf16 %v596_v8  ;;  %v2078_v29 = vld [vmem:[%s2075_s25] sm:$0xff]  ;;  %s2217_s8 = scalar_lea.vmem %s2771_s3, %s1747_s27  ;;  %s1745_s12 = smul.u32 12, %s299_s11 }
  0x1c   : > { %v977_v30 = vperm.slane %v2078_v29, 0  ;;  %s1580_s27 = scalar_lea.sflag [#allocation3], %s299_s11 }
  0x1d   : > { %v599_v10 = vsel %vm598_vm0, %v597_v9, 0.0  ;;  %s301_s13 = scalar_lea.vmem [#allocation2], %s1745_s12 }
  0x1e   : > { %s1593_s24 = sshll.u32 %s301_s13, 4  ;;  %s1594_s24 = int_to_ptr.vmem [resolvable:$true] %s1593_s24 }
  0x21   : > { %436 = vxpose.xlu1.b32.start.end [1/1] (short) (narrow) %v335_v3, 8  ;;  %500 = vxpose.xlu2.b32.start.end [1/1] (short) (narrow) %v337_v4, 8 }
  0x22   : > { %372 = vxpose.xlu0.b32.start.end [1/1] (short) (narrow) %v333_v5, 8 }
  0x29   : > { %564 = vxpose.xlu1.b32.start.end [1/1] (short) (narrow) %v339_v6, 8 }
  0x2a   : > { %532 = vxpose.xlu0.b32.start.end [1/1] (short) (narrow) %v338_v7, 8 }
  0x7c   : > { %1808 = vset.pattern.permute.xlu1 %v979_v28 }
  0x83   : > { %1807 = vset.pattern.permute.xlu2 %v979_v28 }
  0x91   : > { %1809 = vset.pattern.permute.xlu0 %v979_v28 }
  0x92   : > { %600 = vadd.xlane.f32.xlu2 %v599_v10 }
  0xb2   : > { %v484_v11 = vpop.trf.xlu2 }
  0xb3   : > { %v627_v12 = vsel %vm614_vm1, %v484_v11, -inf }
  0xb4   : > { %628 = vmax.xlane.f32.xlu2 %v627_v12 }
  0xba   : > { %v2066_v25 = vpop.trf.xlu2 }
  0xbb   : > { %v630_v26 = vsel %vm614_vm1, %v2066_v25, -inf }
  0xbd   : > { %v420_v13 = vpop.trf.xlu1 }
  0xbe   : > { %v356_v14 = vpop.trf.xlu0  ;;  %v621_v20 = vsel %vm614_vm1, %v420_v13, -inf }
  0xbf   : > { %v615_v15 = vsel %vm614_vm1, %v356_v14, -inf }
  0xc0   : > { %616 = vmax.xlane.f32.xlu0 %v615_v15 }
  0xc5   : > { %v2055_v16 = vpop.trf.xlu1 }
  0xc6   : > { %v388_v17 = vpop.trf.xlu0  ;;  %v624_v24 = vsel %vm614_vm1, %v2055_v16, -inf }
  0xc7   : > { %v618_v18 = vsel %vm614_vm1, %v388_v17, -inf }
  0xc8   : > { %619 = vmax.xlane.f32.xlu1 %v618_v18 }
  0xcd   : > { %v580_v19 = vpop.trf.xlu1 }
  0xce   : > { %v2059_v21 = vpop.trf.xlu0  ;;  %v636_v22 = vsel %vm614_vm1, %v580_v19, -inf }
  0xcf   : > { %637 = vmax.xlane.f32.xlu2 %v636_v22  ;;  %v633_v23 = vsel %vm614_vm1, %v2059_v21, -inf }
  0xd0   : > { %622 = vmax.xlane.f32.xlu1 %v621_v20  ;;  %634 = vmax.xlane.f32.xlu0 %v633_v23 }
  0xd8   : > { %625 = vmax.xlane.f32.xlu1 %v624_v24 }
  0xe0   : > { %631 = vmax.xlane.f32.xlu1 %v630_v26 }
  0xe7   : > { %982 = vperm.xlu2 %1807, %v977_v30  }
 0x105   : > { %v601_v31 = vpop.xlane.xlu2 %600 }
 0x106   : > { %vm602_vm2 = vcmp.gt.f32.partialorder %v601_v31, 0.0 }
 0x107   : > { %v2081_v36 = vsel %vm602_vm2, %v597_v9, 1.0 }
 0x108   : > { %v663_v38 = vperm.slane %v2081_v36, 0  ;;  %v607_v44 = vrot.slane %v2081_v36, 1  ;;  %v610_v52 = vrot.slane %v2081_v36, 4  ;;  %v608_v56 = vrot.slane %v2081_v36, 2 }
 0x109   : > { %v613_v3 = vrot.slane %v2081_v36, 7  ;;  %v611_v23 = vrot.slane %v2081_v36, 5 }
 0x10a   : > { %v664_v49 = vperm.slane %v607_v44, 0  ;;  %v667_v60 = vperm.slane %v610_v52, 0  ;;  %v665_v63 = vperm.slane %v608_v56, 0 }
 0x10b   : > { %v670_v10 = vperm.slane %v613_v3, 0  ;;  %v668_v26 = vperm.slane %v611_v23, 0 }
 0x127   : > { %v629_v35 = vpop.xlane.xlu2 %628 }
 0x128   : > { %v643_v39 = vsub.f32 %v484_v11, %v629_v35  ;;  %v609_v11 = vrot.slane %v2081_v36, 3 }
 0x12a   : > { %v655_v45 = vmul.f32 1.442695, %v643_v39  ;;  %v984_v39 = vperm.slane %v2078_v29, 1 }
 0x133   : > { %v617_v32 = vpop.xlane.xlu0 %616 }
 0x134   : > { %v639_v33 = vsub.f32 %v356_v14, %v617_v32 }
 0x136   : > { %v647_v34 = vmul.f32 1.442695, %v639_v33 }
 0x138   : > { %1810 = vpow2.f32 %v647_v34  ;;  %v1729_v34 = vld [vmem:[%s2075_s25 + $0x8] sm:$0xff] }
 0x139   : > { %v1041_v35 = vperm.slane %v1729_v34, 0  ;;  %v1076_v44 = vperm.slane %v1729_v34, 5 }
 0x13b   : > { %v620_v37 = vpop.xlane.xlu1 %619 }
 0x13c   : > { %v640_v40 = vsub.f32 %v388_v17, %v620_v37  ;;  %v612_v17 = vrot.slane %v2081_v36, 6  ;;  %v1730_v36 = vld [vmem:[%s2075_s25 + $0x10] sm:$0xff]  ;;  %s1595_s25 = sshll.u32 %s1592_s17, 4  ;;  %s1596_s25 = int_to_ptr.hbm [resolvable:$true] %s1595_s25 }
 0x13d   : > { %v1105_v37 = vperm.slane %v1730_v36, 0  ;;  %v1119_v52 = vperm.slane %v1730_v36, 2  ;;  %v1126_v56 = vperm.slane %v1730_v36, 3  ;;  %s1888_s29 = sshra.s32 %s1596_s25, 4  ;;  %s1889_s29 = int_to_ptr.hbm [resolvable:$true] %s1888_s29 }
 0x13e   : > { %v1811_v41 = vpop.eup %1810  ;;  %v649_v42 = vmul.f32 1.442695, %v640_v40  ;;  %v669_v24 = vperm.slane %v612_v17, 0  ;;  %v1069_v40 = vperm.slane %v1729_v34, 4  ;;  %s1890_s7 = scalar_lea.hbm %s1889_s29, 12  ;;  %p1895_p1 = scmp.lt.s32.totalorder %s1889_s29, %s2773_s5 }
 0x13f   : > { %v2084_v43 = vmul.f32 %v1811_v41, %v663_v38  ;;  %v1048_v38 = vperm.slane %v1729_v34, 1  ;;  %v1055_v41 = vperm.slane %v1729_v34, 2  ;;  %p1891_p12 = scmp.ne.s32.totalorder %s1889_s29, %s1890_s7  ;;  %p1896_p2 = scmp.lt.s32.totalorder %s1894_s9, %s1890_s7 }
 0x140   : > { %1812 = vpow2.f32 %v649_v42  ;;  %v991_v42 = vperm.slane %v2078_v29, 2 }
 0x141   : > { %v687_v46 = vsel %vm614_vm1, %v2084_v43, 0.0  ;;  %1814 = vpow2.f32 %v655_v45  ;;  %v1062_v45 = vperm.slane %v1729_v34, 3  ;;  %p1892_p13 = pnand %p1891_p12, %p2026_p4  ;;  %p1897_p3 = por %p1896_p2, %p1895_p1 }
 0x142   : > { %688 = vadd.xlane.f32.xlu1 %v687_v46  ;;  %v638_v47 = vpop.xlane.xlu2 %637  ;;  %v998_v46 = vperm.slane %v2078_v29, 3 }
 0x143   : > { %v623_v48 = vpop.xlane.xlu1 %622  ;;  %v646_v50 = vsub.f32 %v580_v19, %v638_v47  ;;  %v635_v58 = vpop.xlane.xlu0 %634  ;;  %v1083_v47 = vperm.slane %v1729_v34, 6  ;;  %p1893_p0 = pneg %p1892_p13 }
 0x144   : > { %v641_v51 = vsub.f32 %v420_v13, %v623_v48  ;;  %v645_v0 = vsub.f32 %v2059_v21, %v635_v58  ;;  %v1005_v48 = vperm.slane %v2078_v29, 4  ;;  %v1133_v58 = vperm.slane %v1730_v36, 4 }
 0x145   : > { %v661_v57 = vmul.f32 1.442695, %v646_v50  ;;  %v1090_v50 = vperm.slane %v1729_v34, 7  ;;  %p1898_p5 = pnand %p1897_p3, %p1893_p0 }
 0x146   : > { %v1813_v53 = vpop.eup %1812  ;;  %v651_v54 = vmul.f32 1.442695, %v641_v51  ;;  %v659_v7 = vmul.f32 1.442695, %v645_v0  ;;  %v1012_v51 = vperm.slane %v2078_v29, 5 }
 0x147   : > { %v2090_v55 = vmul.f32 %v1813_v53, %v664_v49  ;;  %v1815_v61 = vpop.eup %1814  ;;  %v1112_v49 = vperm.slane %v1730_v36, 1  ;;  %v1154_v53 = vperm.slane %v1730_v36, 7 }
 0x148   : > { %1816 = vpow2.f32 %v651_v54  ;;  %v2097_v2 = vmul.f32 %v1815_v61, %v667_v60  ;;  %v1019_v54 = vperm.slane %v2078_v29, 6  ;;  %v1140_v60 = vperm.slane %v1730_v36, 5 }
 0x149   : > { %v690_v59 = vsel %vm614_vm1, %v2090_v55, 0.0  ;;  %1818 = vpow2.f32 %v661_v57  ;;  %v1026_v57 = vperm.slane %v2078_v29, 7 }
 0x14a   : > { %691 = vadd.xlane.f32.xlu0 %v690_v59  ;;  %v699_v9 = vsel %vm614_vm1, %v2097_v2, 0.0  ;;  %v1147_v59 = vperm.slane %v1730_v36, 6 }
 0x14b   : > { %v626_v62 = vpop.xlane.xlu1 %625 }
 0x14c   : > { %v642_v1 = vsub.f32 %v2055_v16, %v626_v62  ;;  %v666_v16 = vperm.slane %v609_v11, 0 }
 0x14e   : > { %v1817_v4 = vpop.eup %1816  ;;  %v653_v5 = vmul.f32 1.442695, %v642_v1 }
 0x14f   : > { %v2100_v6 = vmul.f32 %v1817_v4, %v665_v63  ;;  %v1819_v12 = vpop.eup %1818  ;;  %v2135_v63 = vpop.permute.xlu2 %982 }
 0x150   : > { %1820 = vpow2.f32 %v653_v5  ;;  %v2108_v15 = vmul.f32 %v1819_v12, %v670_v10 }
 0x151   : > { %v693_v8 = vsel %vm614_vm1, %v2100_v6, 0.0  ;;  %1822 = vpow2.f32 %v659_v7 }
 0x152   : > { %694 = vadd.xlane.f32.xlu2 %v693_v8  ;;  %700 = vadd.xlane.f32.xlu0 %v699_v9  ;;  %v708_v21 = vsel %vm614_vm1, %v2108_v15, 0.0 }
 0x153   : > { %v632_v13 = vpop.xlane.xlu1 %631 }
 0x154   : > { %v644_v14 = vsub.f32 %v2066_v25, %v632_v13 }
 0x156   : > { %v1821_v18 = vpop.eup %1820  ;;  %v657_v19 = vmul.f32 1.442695, %v644_v14 }
 0x157   : > { %v2111_v20 = vmul.f32 %v1821_v18, %v666_v16  ;;  %v1823_v25 = vpop.eup %1822 }
 0x158   : > { %1824 = vpow2.f32 %v657_v19  ;;  %v2118_v28 = vmul.f32 %v1823_v25, %v669_v24 }
 0x159   : > { %v696_v22 = vsel %vm614_vm1, %v2111_v20, 0.0 }
 0x15a   : > { %709 = vadd.xlane.f32.xlu0 %v708_v21  ;;  %697 = vadd.xlane.f32.xlu1 %v696_v22  ;;  %v705_v33 = vsel %vm614_vm1, %v2118_v28, 0.0 }
 0x15e   : > { %v1825_v30 = vpop.eup %1824 }
 0x15f   : > { %v2120_v31 = vmul.f32 %v1825_v30, %v668_v26 }
 0x161   : > { %v702_v32 = vsel %vm614_vm1, %v2120_v31, 0.0 }
 0x162   : > { %703 = vadd.xlane.f32.xlu2 %v702_v32  ;;  %706 = vadd.xlane.f32.xlu1 %v705_v33 }
 0x16e   : > { %1046 = vperm.xlu0 %1809, %v1041_v35  }
 0x176   : > { %1110 = vperm.xlu0 %1809, %v1105_v37  }
 0x17a   : > { %1053 = vperm.xlu2 %1807, %v1048_v38  }
 0x17b   : > { %989 = vperm.xlu1 %1808, %v984_v39  }
 0x17e   : > { %1074 = vperm.xlu0 %1809, %v1069_v40  }
 0x182   : > { %1060 = vperm.xlu2 %1807, %v1055_v41  }
 0x183   : > { %996 = vperm.xlu1 %1808, %v991_v42  }
 0x186   : > { %1081 = vperm.xlu0 %1809, %v1076_v44  }
 0x18a   : > { %1067 = vperm.xlu2 %1807, %v1062_v45  }
 0x18b   : > { %1003 = vperm.xlu1 %1808, %v998_v46  }
 0x18e   : > { %1088 = vperm.xlu0 %1809, %v1083_v47  }
 0x192   : > { %1010 = vperm.xlu2 %1807, %v1005_v48  }
 0x193   : > { %1117 = vperm.xlu1 %1808, %v1112_v49  }
 0x196   : > { %1095 = vperm.xlu0 %1809, %v1090_v50  }
 0x19a   : > { %1017 = vperm.xlu2 %1807, %v1012_v51  }
 0x19b   : > { %1124 = vperm.xlu1 %1808, %v1119_v52  }
 0x19e   : > { %1159 = vperm.xlu0 %1809, %v1154_v53  }
 0x1a2   : > { %1024 = vperm.xlu2 %1807, %v1019_v54  }
 0x1a3   : > { %1131 = vperm.xlu1 %1808, %v1126_v56  }
 0x1aa   : > { %1031 = vperm.xlu2 %1807, %v1026_v57  }
 0x1ab   : > { %1138 = vperm.xlu1 %1808, %v1133_v58  }
 0x1b2   : > { %1152 = vperm.xlu2 %1807, %v1147_v59  }
 0x1b3   : > { %1145 = vperm.xlu1 %1808, %v1140_v60  }
 0x1b5   : > { %v689_v61 = vpop.xlane.xlu1 %688 }
 0x1b6   : > { %1826 = vrcp.f32 %v689_v61  ;;  %v722_v10 = vand.u32 2147483648, %v689_v61  ;;  %vm716_vm4 = vweird.f32 %v689_v61  ;;  %v720_v12 = vand.u32 2147483647, %v689_v61 }
 0x1b8   : > { %v723_v16 = vor.u32 1.1754944e-38, %v722_v10  ;;  %vm721_vm8 = vcmp.eq.f32.partialorder %v720_v12, 8.507059e+37 }
 0x1bc   : > { %v1827_v62 = vpop.eup %1826 }
 0x1bd   : > { %v712_v0 = vmul.f32 %v1827_v62, %v689_v61  ;;  %v692_v1 = vpop.xlane.xlu0 %691  ;;  %vm717_vm3 = vweird.f32 %v1827_v62 }
 0x1be   : > { %1828 = vrcp.f32 %v692_v1  ;;  %vm718_vm5 = vmor %vm716_vm4, %vm717_vm3  ;;  %v737_v17 = vand.u32 2147483648, %v692_v1  ;;  %vm731_vm7 = vweird.f32 %v692_v1  ;;  %v735_v19 = vand.u32 2147483647, %v692_v1 }
 0x1bf   : > { %v713_v3 = vsub.f32 1.0, %v712_v0 }
 0x1c0   : > { %v738_v33 = vor.u32 1.1754944e-38, %v737_v17  ;;  %vm736_vm10 = vcmp.eq.f32.partialorder %v735_v19, 8.507059e+37 }
 0x1c1   : > { %v714_v4 = vmul.f32 %v1827_v62, %v713_v3 }
 0x1c3   : > { %v715_v9 = vadd.f32 %v1827_v62, %v714_v4 }
 0x1c4   : > { %v1829_v5 = vpop.eup %1828 }
 0x1c5   : > { %v727_v29 = vmul.f32 %v1829_v5, %v692_v1  ;;  %v695_v7 = vpop.xlane.xlu2 %694  ;;  %v2137_v8 = vpop.xlane.xlu0 %700  ;;  %vm732_vm6 = vweird.f32 %v1829_v5  ;;  %v719_v14 = vsel %vm718_vm5, %v1827_v62, %v715_v9 }
 0x1c6   : > { %1830 = vrcp.f32 %v695_v7  ;;  %vm2140_vm9 = vmor %vm731_vm7, %vm732_vm6  ;;  %v724_v23 = vsel %vm721_vm8, %v723_v16, %v719_v14  ;;  %v752_v37 = vand.u32 2147483648, %v695_v7  ;;  %v782_v41 = vand.u32 2147483648, %v2137_v8 }
 0x1c7   : > { %v728_v11 = vsub.f32 1.0, %v727_v29  ;;  %1832 = vrcp.f32 %v2137_v8  ;;  %v2154_v36 = vmul.f32 %v724_v23, %v2084_v43  ;;  %v750_v42 = vand.u32 2147483647, %v695_v7 }
 0x1c8   : > { %v780_v46 = vand.u32 2147483647, %v2137_v8  ;;  %vm746_vm12 = vweird.f32 %v695_v7  ;;  %v753_v50 = vor.u32 1.1754944e-38, %v752_v37  ;;  %vm776_vm14 = vweird.f32 %v2137_v8 }
 0x1c9   : > { %v729_v13 = vmul.f32 %v1829_v5, %v728_v11  ;;  %v839_v43 = vmul.f32 %v2154_v36, %v2154_v36  ;;  %vm751_vm0 = vcmp.eq.f32.partialorder %v750_v42, 8.507059e+37 }
 0x1ca   : > { %vm781_vm2 = vcmp.eq.f32.partialorder %v780_v46, 8.507059e+37  ;;  %v2235_v46 = vld [vmem:[%s2217_s8] sm:$0xf] }
 0x1cb   : > { %v730_v18 = vadd.f32 %v1829_v5, %v729_v13  ;;  %v847_v62 = vsel %vm614_vm1, %v839_v43, 0.0 }
 0x1cc   : > { %v1831_v21 = vpop.eup %1830 }
 0x1cd   : > { %v1833_v24 = vpop.eup %1832  ;;  %v742_v25 = vmul.f32 %v1831_v21, %v695_v7  ;;  %v2144_v26 = vpop.xlane.xlu1 %697  ;;  %v734_v32 = vsel %vm2140_vm9, %v1829_v5, %v730_v18  ;;  %vm747_vm11 = vweird.f32 %v1831_v21 }
 0x1ce   : > { %v2146_v30 = vpop.xlane.xlu0 %709  ;;  %v772_v34 = vmul.f32 %v1833_v24, %v2137_v8  ;;  %1834 = vrcp.f32 %v2144_v26  ;;  %v739_v39 = vsel %vm736_vm10, %v738_v33, %v734_v32  ;;  %vm2163_vm13 = vmor %vm746_vm12, %vm747_vm11  ;;  %vm777_vm15 = vweird.f32 %v1833_v24 }
 0x1cf   : > { %v743_v35 = vsub.f32 1.0, %v742_v25  ;;  %1836 = vrcp.f32 %v2146_v30  ;;  %v2158_v45 = vmul.f32 %v739_v39, %v2090_v55  ;;  %v783_v55 = vor.u32 1.1754944e-38, %v782_v41  ;;  %vm778_vm3 = vmor %vm776_vm14, %vm777_vm15 }
 0x1d0   : > { %v773_v38 = vsub.f32 1.0, %v772_v34  ;;  %v767_v61 = vand.u32 2147483648, %v2144_v26  ;;  %v765_v3 = vand.u32 2147483647, %v2144_v26  ;;  %v827_v9 = vand.u32 2147483648, %v2146_v30 }
 0x1d1   : > { %v744_v40 = vmul.f32 %v1831_v21, %v743_v35  ;;  %v840_v59 = vmul.f32 %v2158_v45, %v2158_v45  ;;  %v825_v11 = vand.u32 2147483647, %v2146_v30  ;;  %vm761_vm5 = vweird.f32 %v2144_v26 }
 0x1d2   : > { %v774_v44 = vmul.f32 %v1833_v24, %v773_v38  ;;  %vm821_vm6 = vweird.f32 %v2146_v30  ;;  %v768_v16 = vor.u32 1.1754944e-38, %v767_v61  ;;  %vm766_vm9 = vcmp.eq.f32.partialorder %v765_v3, 8.507059e+37 }
 0x1d3   : > { %v745_v47 = vadd.f32 %v1831_v21, %v744_v40  ;;  %v850_v10 = vsel %vm614_vm1, %v840_v59, 0.0  ;;  %v828_v25 = vor.u32 1.1754944e-38, %v827_v9  ;;  %vm826_vm10 = vcmp.eq.f32.partialorder %v825_v11, 8.507059e+37 }
 0x1d4   : > { %v1835_v48 = vpop.eup %1834  ;;  %v775_v51 = vadd.f32 %v1833_v24, %v774_v44 }
 0x1d5   : > { %v2168_v52 = vpop.eup %1836  ;;  %v757_v53 = vmul.f32 %v1835_v48, %v2144_v26  ;;  %v2171_v54 = vpop.xlane.xlu2 %703  ;;  %v749_v57 = vsel %vm2163_vm13, %v1831_v21, %v745_v47  ;;  %vm762_vm4 = vweird.f32 %v1835_v48  ;;  %v2239_v47 = vld [vmem:[%s2217_s8 + $0x4] sm:$0xf] }
 0x1d6   : > { %v2173_v56 = vpop.xlane.xlu1 %706  ;;  %v817_v58 = vmul.f32 %v2168_v52, %v2146_v30  ;;  %1838 = vrcp.f32 %v2171_v54  ;;  %v754_v1 = vsel %vm751_vm0, %v753_v50, %v749_v57  ;;  %v779_v4 = vsel %vm778_vm3, %v1833_v24, %v775_v51  ;;  %vm2198_vm7 = vmor %vm761_vm5, %vm762_vm4 }
 0x1d7   : > { %v758_v60 = vsub.f32 1.0, %v757_v53  ;;  %1840 = vrcp.f32 %v2173_v56  ;;  %v2187_v29 = vmul.f32 %v754_v1, %v2100_v6  ;;  %v784_v7 = vsel %vm781_vm2, %v783_v55, %v779_v4 }
 0x1d8   : > { %v818_v0 = vsub.f32 1.0, %v817_v58  ;;  %vm822_vm8 = vweird.f32 %v2168_v52  ;;  %v2204_v17 = vmul.f32 %v784_v7, %v2097_v2  ;;  %v797_v33 = vand.u32 2147483648, %v2171_v54 }
 0x1d9   : > { %v759_v5 = vmul.f32 %v1835_v48, %v758_v60  ;;  %v841_v12 = vmul.f32 %v2187_v29, %v2187_v29  ;;  %vm823_vm11 = vmor %vm821_vm6, %vm822_vm8  ;;  %v812_v34 = vand.u32 2147483648, %v2173_v56  ;;  %v795_v40 = vand.u32 2147483647, %v2171_v54  ;;  %v2264_v60 = vld [vmem:[%s2217_s8 + $0x8] sm:$0xf] }
 0x1da   : > { %v819_v8 = vmul.f32 %v2168_v52, %v818_v0  ;;  %v843_v39 = vmul.f32 %v2204_v17, %v2204_v17  ;;  %vm791_vm13 = vweird.f32 %v2171_v54  ;;  %v810_v43 = vand.u32 2147483647, %v2173_v56 }
 0x1db   : > { %851 = vadd.xlane.f32.xlu2 %v850_v10  ;;  %v760_v6 = vadd.f32 %v1835_v48, %v759_v5  ;;  %v853_v22 = vsel %vm614_vm1, %v841_v12, 0.0  ;;  %vm806_vm15 = vweird.f32 %v2173_v56  ;;  %v813_v57 = vor.u32 1.1754944e-38, %v812_v34 }
 0x1dc   : > { %v1839_v13 = vpop.eup %1838  ;;  %v820_v18 = vadd.f32 %v2168_v52, %v819_v8  ;;  %854 = vadd.xlane.f32.xlu0 %v853_v22  ;;  %v859_v55 = vsel %vm614_vm1, %v843_v39, 0.0  ;;  %vm796_vm3 = vcmp.eq.f32.partialorder %v795_v40, 8.507059e+37  ;;  %vm811_vm4 = vcmp.eq.f32.partialorder %v810_v43, 8.507059e+37 }
 0x1dd   : > { %v1841_v19 = vpop.eup %1840  ;;  %v787_v21 = vmul.f32 %v1839_v13, %v2171_v54  ;;  %v2209_v23 = vpop.permute.xlu2 %1053  ;;  %848 = vadd.xlane.f32.xlu1 %v847_v62  ;;  %v764_v24 = vsel %vm2198_vm7, %v1835_v48, %v760_v6  ;;  %vm792_vm12 = vweird.f32 %v1839_v13 }
 0x1de   : > { %v802_v26 = vmul.f32 %v1841_v19, %v2173_v56  ;;  %v769_v2 = vsel %vm766_vm9, %v768_v16, %v764_v24  ;;  %v824_v30 = vsel %vm823_vm11, %v2168_v52, %v820_v18  ;;  %vm807_vm14 = vweird.f32 %v1841_v19  ;;  %vm2247_vm0 = vmor %vm791_vm13, %vm792_vm12 }
 0x1df   : > { %v788_v32 = vsub.f32 1.0, %v787_v21  ;;  %v2226_v35 = vmul.f32 %v769_v2, %v2111_v20  ;;  %v829_v44 = vsel %vm826_vm10, %v828_v25, %v824_v30  ;;  %v798_v52 = vor.u32 1.1754944e-38, %v797_v33  ;;  %vm808_vm2 = vmor %vm806_vm15, %vm807_vm14 }
 0x1e0   : > { %v803_v37 = vsub.f32 1.0, %v802_v26  ;;  %v1047_v38 = vpop.permute.xlu0 %1046  ;;  %v2253_v54 = vmul.f32 %v829_v44, %v2108_v15  ;;  %v2257_v56 = vsub.f32 %v2135_v63, %v2235_v46  ;;  %v2299_v40 = vsub.f32 %v2209_v23, %v2239_v47 }
 0x1e1   : > { %v789_v41 = vmul.f32 %v1839_v13, %v788_v32  ;;  %v842_v42 = vmul.f32 %v2226_v35, %v2226_v35  ;;  %v2244_v48 = vsub.f32 %v1047_v38, %v2239_v47 }
 0x1e2   : > { %v804_v20 = vmul.f32 %v1841_v19, %v803_v37  ;;  %v846_v4 = vmul.f32 %v2253_v54, %v2253_v54  ;;  %v1169_v5 = vmul.f32 %v2257_v56, %v2257_v56 }
 0x1e3   : > { %v856_v49 = vsel %vm614_vm1, %v842_v42, 0.0  ;;  %v790_v50 = vadd.f32 %v1839_v13, %v789_v41  ;;  %v1177_v15 = vmul.f32 %v2244_v48, %v2244_v48 }
 0x1e4   : > { %857 = vadd.xlane.f32.xlu2 %v856_v49  ;;  %v805_v53 = vadd.f32 %v1841_v19, %v804_v20  ;;  %v868_v12 = vsel %vm614_vm1, %v846_v4, 0.0  ;;  %v1178_v49 = vmul.f32 %v2299_v40, %v2299_v40 }
 0x1e5   : > { %v2259_v58 = vpop.permute.xlu2 %1060  ;;  %860 = vadd.xlane.f32.xlu1 %v859_v55  ;;  %v794_v59 = vsel %vm2247_vm0, %v1839_v13, %v790_v50 }
 0x1e6   : > { %v809_v61 = vsel %vm808_vm2, %v1841_v19, %v805_v53  ;;  %v799_v62 = vsel %vm796_vm3, %v798_v52, %v794_v59  ;;  %v2320_v53 = vsub.f32 %v2259_v58, %v2239_v47 }
 0x1e7   : > { %v814_v0 = vsel %vm811_vm4, %v813_v57, %v809_v61  ;;  %v2269_v63 = vmul.f32 %v799_v62, %v2120_v31  ;;  %v1185_v31 = vadd.f32 %v1177_v15, %v1169_v5 }
 0x1e8   : > { %v1111_v1 = vpop.permute.xlu0 %1110  ;;  %v2272_v3 = vmul.f32 %v814_v0, %v2118_v28  ;;  %v1179_v15 = vmul.f32 %v2320_v53, %v2320_v53 }
 0x1e9   : > { %v1161_v7 = vsub.f32 %v1111_v1, %v2264_v60  ;;  %v844_v8 = vmul.f32 %v2269_v63, %v2269_v63 }
 0x1ea   : > { %v845_v9 = vmul.f32 %v2272_v3, %v2272_v3 }
 0x1eb   : > { %v1193_v10 = vmul.f32 %v1161_v7, %v1161_v7  ;;  %v862_v11 = vsel %vm614_vm1, %v844_v8, 0.0 }
 0x1ec   : > { %v865_v28 = vsel %vm614_vm1, %v845_v9, 0.0  ;;  %863 = vadd.xlane.f32.xlu2 %v862_v11 }
 0x1ed   : > { %v1201_v6 = vadd.f32 %v1193_v10, %v1185_v31  ;;  %866 = vadd.xlane.f32.xlu0 %v865_v28  ;;  %v1068_v13 = vpop.permute.xlu2 %1067  ;;  %v990_v14 = vpop.permute.xlu1 %989  ;;  %869 = vadd.xlane.f32.xlu1 %v868_v12 }
 0x1ee   : > { %v2295_v37 = vsub.f32 %v990_v14, %v2235_v46 }
 0x1ef   : > { %v1209_v16 = vadd.f32 1e-12, %v1201_v6  ;;  %v2354_v6 = vsub.f32 %v1068_v13, %v2239_v47 }
 0x1f0   : > { %v2286_v18 = vpop.permute.xlu0 %1074  ;;  %v1170_v42 = vmul.f32 %v2295_v37, %v2295_v37 }
 0x1f1   : > { %1842 = vrsqrt.f32 %v1209_v16  ;;  %vm1223_vm6 = vweird.f32 %v1209_v16 }
 0x1f5   : > { %v2288_v19 = vpop.permute.xlu2 %1010  ;;  %v997_v21 = vpop.permute.xlu1 %996 }
 0x1f6   : > { %v2313_v23 = vsub.f32 %v997_v21, %v2235_v46 }
 0x1f7   : > { %v1843_v22 = vpop.eup %1842 }
 0x1f8   : > { %v1218_v24 = vmul.f32 %v1843_v22, %v1209_v16  ;;  %v2290_v25 = vpop.permute.xlu0 %1081  ;;  %vm1224_vm5 = vweird.f32 %v1843_v22  ;;  %v1171_v59 = vmul.f32 %v2313_v23, %v2313_v23 }
 0x1f9   : > { %vm1225_vm7 = vmor %vm1223_vm6, %vm1224_vm5 }
 0x1fa   : > { %v1219_v26 = vmul.f32 %v1843_v22, %v1218_v24  ;;  %v1187_v5 = vadd.f32 %v1179_v15, %v1171_v59 }
 0x1fc   : > { %v1220_v2 = vmul.f32 0.5, %v1219_v26 }
 0x1fd   : > { %v2292_v32 = vpop.permute.xlu2 %1017  ;;  %v1004_v33 = vpop.permute.xlu1 %1003 }
 0x1fe   : > { %v1221_v34 = vsub.f32 1.5, %v1220_v2 }
 0x200   : > { %v1089_v38 = vpop.permute.xlu0 %1088  ;;  %v1222_v39 = vmul.f32 %v1843_v22, %v1221_v34 }
 0x201   : > { %v2339_v8 = vsub.f32 %v1089_v38, %v2239_v47 }
 0x202   : > { %v1226_v30 = vsel %vm1225_vm7, %v1843_v22, %v1222_v39 }
 0x203   : > { %v2302_v41 = vmul.f32 %v1226_v30, %v2154_v36  ;;  %v1186_v36 = vadd.f32 %v1178_v49, %v1170_v42  ;;  %v1183_v26 = vmul.f32 %v2339_v8, %v2339_v8  ;;  %v1180_v30 = vmul.f32 %v2354_v6, %v2354_v6 }
 0x205   : > { %v1025_v44 = vpop.permute.xlu2 %1024  ;;  %v1118_v20 = vpop.permute.xlu1 %1117  ;;  %v1385_v43 = vmul.f32 %v2302_v41, %v1161_v7  ;;  %v2336_v7 = vsub.f32 %v1004_v33, %v2235_v46 }
 0x206   : > { %v2310_v50 = vsub.f32 %v1118_v20, %v2264_v60  ;;  %v2342_v9 = vsub.f32 %v1025_v44, %v2235_v46  ;;  %v2377_v20 = vsub.f32 %v2286_v18, %v2239_v47 }
 0x207   : > { %v1393_v51 = vsel %vm614_vm1, %v1385_v43, 0.0  ;;  %v1172_v24 = vmul.f32 %v2336_v7, %v2336_v7  ;;  %v2381_v43 = vsub.f32 %v2288_v19, %v2235_v46 }
 0x208   : > { %v1194_v52 = vmul.f32 %v2310_v50, %v2310_v50  ;;  %1394 = vadd.xlane.f32.xlu2 %v1393_v51  ;;  %v1096_v55 = vpop.permute.xlu0 %1095  ;;  %v1175_v2 = vmul.f32 %v2342_v9, %v2342_v9 }
 0x209   : > { %v2325_v62 = vsub.f32 %v1096_v55, %v2239_v47 }
 0x20a   : > { %v1202_v57 = vadd.f32 %v1194_v52, %v1186_v36  ;;  %v1188_v36 = vadd.f32 %v1180_v30, %v1172_v24  ;;  %v1191_v52 = vadd.f32 %v1183_v26, %v1175_v2  ;;  %v2405_v24 = vsub.f32 %v2290_v25, %v2239_v47 }
 0x20b   : > { %v1184_v31 = vmul.f32 %v2325_v62, %v2325_v62 }
 0x20c   : > { %v1210_v61 = vadd.f32 1e-12, %v1202_v57 }
 0x20d   : > { %v1032_v0 = vpop.permute.xlu2 %1031  ;;  %v1125_v1 = vpop.permute.xlu1 %1124 }
 0x20e   : > { %1844 = vrsqrt.f32 %v1210_v61  ;;  %v2330_v4 = vsub.f32 %v1032_v0, %v2235_v46  ;;  %v2333_v58 = vsub.f32 %v1125_v1, %v2264_v60  ;;  %v1181_v1 = vmul.f32 %v2377_v20, %v2377_v20 }
 0x20f   : > { %vm1233_vm9 = vweird.f32 %v1210_v61 }
 0x210   : > { %v1176_v10 = vmul.f32 %v2330_v4, %v2330_v4  ;;  %v1195_v11 = vmul.f32 %v2333_v58, %v2333_v58  ;;  %v1160_v28 = vpop.permute.xlu0 %1159 }
 0x211   : > { %v2351_v12 = vsub.f32 %v1160_v28, %v2264_v60 }
 0x212   : > { %v1192_v14 = vadd.f32 %v1184_v31, %v1176_v10  ;;  %v1203_v16 = vadd.f32 %v1195_v11, %v1187_v5  ;;  %v1173_v5 = vmul.f32 %v2381_v43, %v2381_v43 }
 0x213   : > { %v1200_v21 = vmul.f32 %v2351_v12, %v2351_v12 }
 0x214   : > { %v1845_v22 = vpop.eup %1844  ;;  %v2364_v33 = vadd.f32 1e-12, %v1203_v16 }
 0x215   : > { %v1228_v34 = vmul.f32 %v1845_v22, %v1210_v61  ;;  %v1208_v13 = vadd.f32 %v1200_v21, %v1192_v14  ;;  %v1153_v38 = vpop.permute.xlu2 %1152  ;;  %v1132_v39 = vpop.permute.xlu1 %1131  ;;  %vm1234_vm8 = vweird.f32 %v1845_v22  ;;  %v1189_v61 = vadd.f32 %v1181_v1, %v1173_v5 }
 0x216   : > { %1846 = vrsqrt.f32 %v2364_v33  ;;  %v2370_v42 = vsub.f32 %v1153_v38, %v2264_v60  ;;  %v2373_v44 = vsub.f32 %v1132_v39, %v2264_v60  ;;  %vm1235_vm10 = vmor %vm1233_vm9, %vm1234_vm8  ;;  %v2416_v39 = vsub.f32 %v2292_v32, %v2235_v46 }
 0x217   : > { %v1229_v49 = vmul.f32 %v1845_v22, %v1228_v34  ;;  %v2383_v51 = vadd.f32 1e-12, %v1208_v13  ;;  %vm1243_vm12 = vweird.f32 %v2364_v33 }
 0x218   : > { %v1199_v55 = vmul.f32 %v2370_v42, %v2370_v42  ;;  %v1196_v57 = vmul.f32 %v2373_v44, %v2373_v44  ;;  %v1174_v32 = vmul.f32 %v2416_v39, %v2416_v39 }
 0x219   : > { %v1230_v59 = vmul.f32 0.5, %v1229_v49  ;;  %1848 = vrsqrt.f32 %v2383_v51  ;;  %vm1293_vm15 = vweird.f32 %v2383_v51 }
 0x21a   : > { %v1207_v18 = vadd.f32 %v1199_v55, %v1191_v52  ;;  %v1204_v15 = vadd.f32 %v1196_v57, %v1188_v36  ;;  %v1182_v52 = vmul.f32 %v2405_v24, %v2405_v24 }
 0x21b   : > { %v1231_v0 = vsub.f32 1.5, %v1230_v59 }
 0x21c   : > { %v1847_v19 = vpop.eup %1846  ;;  %v2394_v31 = vadd.f32 1e-12, %v1207_v18  ;;  %v2396_v10 = vadd.f32 1e-12, %v1204_v15 }
 0x21d   : > { %v1238_v11 = vmul.f32 %v1847_v19, %v2364_v33  ;;  %v1139_v28 = vpop.permute.xlu1 %1138  ;;  %v1232_v14 = vmul.f32 %v1845_v22, %v1231_v0  ;;  %vm1244_vm11 = vweird.f32 %v1847_v19 }
 0x21e   : > { %1850 = vrsqrt.f32 %v2394_v31  ;;  %v2401_v16 = vsub.f32 %v1139_v28, %v2264_v60  ;;  %vm1245_vm13 = vmor %vm1243_vm12, %vm1244_vm11  ;;  %vm1253_vm3 = vweird.f32 %v2396_v10  ;;  %vm1283_vm6 = vweird.f32 %v2394_v31 }
 0x21f   : > { %v1849_v21 = vpop.eup %1848  ;;  %v1239_v26 = vmul.f32 %v1847_v19, %v1238_v11  ;;  %1852 = vrsqrt.f32 %v2396_v10  ;;  %v1236_v2 = vsel %vm1235_vm10, %v1845_v22, %v1232_v14 }
 0x220   : > { %v1288_v34 = vmul.f32 %v1849_v21, %v2383_v51  ;;  %v1197_v13 = vmul.f32 %v2401_v16, %v2401_v16  ;;  %v2412_v38 = vmul.f32 %v1236_v2, %v2158_v45  ;;  %vm1294_vm14 = vweird.f32 %v1849_v21 }
 0x221   : > { %v1240_v30 = vmul.f32 0.5, %v1239_v26  ;;  %v1190_v26 = vadd.f32 %v1182_v52, %v1174_v32  ;;  %vm1295_vm0 = vmor %vm1293_vm15, %vm1294_vm14 }
 0x222   : > { %v1289_v47 = vmul.f32 %v1849_v21, %v1288_v34  ;;  %v1205_v25 = vadd.f32 %v1197_v13, %v1189_v61  ;;  %v1386_v49 = vmul.f32 %v2412_v38, %v2310_v50 }
 0x223   : > { %v1241_v22 = vsub.f32 1.5, %v1240_v30 }
 0x224   : > { %v2420_v36 = vpop.eup %1850  ;;  %v1290_v55 = vmul.f32 0.5, %v1289_v47  ;;  %v2424_v45 = vadd.f32 1e-12, %v1205_v25  ;;  %v1396_v57 = vsel %vm614_vm1, %v1386_v49, 0.0 }
 0x225   : > { %v1853_v46 = vpop.eup %1852  ;;  %v1278_v50 = vmul.f32 %v2420_v36, %v2394_v31  ;;  %v1146_v59 = vpop.permute.xlu1 %1145  ;;  %1397 = vadd.xlane.f32.xlu0 %v1396_v57  ;;  %v1242_v18 = vmul.f32 %v1847_v19, %v1241_v22  ;;  %vm1284_vm4 = vweird.f32 %v2420_v36 }
 0x226   : > { %v1291_v15 = vsub.f32 1.5, %v1290_v55  ;;  %v1248_v0 = vmul.f32 %v1853_v46, %v2396_v10  ;;  %1854 = vrsqrt.f32 %v2424_v45  ;;  %v2437_v5 = vsub.f32 %v1146_v59, %v2264_v60  ;;  %vm1285_vm7 = vmor %vm1283_vm6, %vm1284_vm4 }
 0x227   : > { %v1279_v1 = vmul.f32 %v2420_v36, %v1278_v50  ;;  %v1246_v11 = vsel %vm1245_vm13, %v1847_v19, %v1242_v18  ;;  %vm1254_vm2 = vweird.f32 %v1853_v46  ;;  %vm1263_vm9 = vweird.f32 %v2424_v45 }
 0x228   : > { %v1249_v33 = vmul.f32 %v1853_v46, %v1248_v0  ;;  %v2440_v28 = vmul.f32 %v1246_v11, %v2187_v29  ;;  %v1292_v14 = vmul.f32 %v1849_v21, %v1291_v15  ;;  %v1198_v61 = vmul.f32 %v2437_v5, %v2437_v5  ;;  %vm1255_vm5 = vmor %vm1253_vm3, %vm1254_vm2 }
 0x229   : > { %v1280_v2 = vmul.f32 0.5, %v1279_v1 }
 0x22a   : > { %v1250_v34 = vmul.f32 0.5, %v1249_v33  ;;  %v1387_v13 = vmul.f32 %v2440_v28, %v2333_v58  ;;  %v1206_v19 = vadd.f32 %v1198_v61, %v1190_v26  ;;  %v1296_v30 = vsel %vm1295_vm0, %v1849_v21, %v1292_v14 }
 0x22b   : > { %v1281_v60 = vsub.f32 1.5, %v1280_v2  ;;  %v2453_v58 = vmul.f32 %v1296_v30, %v2253_v54 }
 0x22c   : > { %v1855_v47 = vpop.eup %1854  ;;  %v1251_v25 = vsub.f32 1.5, %v1250_v34  ;;  %v1399_v29 = vsel %vm614_vm1, %v1387_v13, 0.0  ;;  %v1214_v49 = vadd.f32 1e-12, %v1206_v19  ;;  %v1347_v19 = vmul.f32 %v2440_v28, %v2320_v53 }
 0x22d   : > { %v1258_v51 = vmul.f32 %v1855_v47, %v2424_v45  ;;  %1400 = vadd.xlane.f32.xlu1 %v1399_v29  ;;  %v1282_v52 = vmul.f32 %v2420_v36, %v1281_v60  ;;  %v1392_v10 = vmul.f32 %v2453_v58, %v2351_v12  ;;  %v2461_v50 = vmul.f32 %v2453_v58, %v2325_v62 }
 0x22e   : > { %v1252_v22 = vmul.f32 %v1853_v46, %v1251_v25  ;;  %1856 = vrsqrt.f32 %v1214_v49  ;;  %vm1264_vm8 = vweird.f32 %v1855_v47  ;;  %vm1273_vm12 = vweird.f32 %v1214_v49 }
 0x22f   : > { %v1259_v21 = vmul.f32 %v1855_v47, %v1258_v51  ;;  %v1286_v54 = vsel %vm1285_vm7, %v2420_v36, %v1282_v52  ;;  %vm1265_vm10 = vmor %vm1263_vm9, %vm1264_vm8  ;;  %v1359_v30 = vsel %vm614_vm1, %v1347_v19, 0.0 }
 0x230   : > { %v1256_v55 = vsel %vm1255_vm5, %v1853_v46, %v1252_v22  ;;  %v2468_v46 = vmul.f32 %v1286_v54, %v2272_v3  ;;  %v1312_v22 = vmul.f32 %v2453_v58, %v2330_v4 }
 0x231   : > { %v1260_v57 = vmul.f32 0.5, %v1259_v21  ;;  %v1300_v32 = vmul.f32 %v1256_v55, %v2226_v35 }
 0x232   : > { %v1351_v51 = vmul.f32 %v2468_v46, %v2339_v8  ;;  %v1334_v52 = vsel %vm614_vm1, %v1312_v22, 0.0 }
 0x233   : > { %v1261_v59 = vsub.f32 1.5, %v1260_v57  ;;  %v1388_v18 = vmul.f32 %v1300_v32, %v2373_v44  ;;  %v1391_v44 = vmul.f32 %v2468_v46, %v2370_v42  ;;  %v1308_v25 = vmul.f32 %v1300_v32, %v2336_v7 }
 0x234   : > { %v1857_v15 = vpop.eup %1856  ;;  %v1371_v7 = vsel %vm614_vm1, %v1351_v51, 0.0 }
 0x235   : > { %v1402_v31 = vsel %vm614_vm1, %v1388_v18, 0.0  ;;  %v1262_v12 = vmul.f32 %v1855_v47, %v1261_v59  ;;  %v1268_v35 = vmul.f32 %v1857_v15, %v1214_v49  ;;  %vm1274_vm11 = vweird.f32 %v1857_v15 }
 0x236   : > { %1403 = vadd.xlane.f32.xlu2 %v1402_v31  ;;  %v1411_v3 = vsel %vm614_vm1, %v1391_v44, 0.0  ;;  %vm1275_vm13 = vmor %vm1273_vm12, %vm1274_vm11  ;;  %vm1444_vm12 = vcmask 1041409  }
 0x237   : > { %v1266_v62 = vsel %vm1265_vm10, %v1855_v47, %v1262_v12  ;;  %v1269_v0 = vmul.f32 %v1857_v15, %v1268_v35 }
 0x238   : > { %v1301_v36 = vmul.f32 %v1266_v62, %v2204_v17  ;;  %v1305_v17 = vmul.f32 %v2302_v41, %v2257_v56  ;;  %v1346_v56 = vmul.f32 %v2412_v38, %v2299_v40  ;;  %v1348_v40 = vmul.f32 %v1300_v32, %v2354_v6 }
 0x239   : > { %v1270_v1 = vmul.f32 0.5, %v1269_v0  ;;  %v1322_v6 = vsel %vm614_vm1, %v1308_v25, 0.0 }
 0x23a   : > { %v1389_v11 = vmul.f32 %v1301_v36, %v2401_v16  ;;  %v1345_v16 = vmul.f32 %v2302_v41, %v2244_v48  ;;  %v1313_v61 = vsel %vm614_vm1, %v1305_v17, 0.0  ;;  %v1307_v48 = vmul.f32 %v2440_v28, %v2313_v23 }
 0x23b   : > { %v1271_v45 = vsub.f32 1.5, %v1270_v1  ;;  %v1356_v41 = vsel %vm614_vm1, %v1346_v56, 0.0  ;;  %v1414_v23 = vsel %vm614_vm1, %v1392_v10, 0.0 }
 0x23c   : > { %v1405_v33 = vsel %vm614_vm1, %v1389_v11, 0.0  ;;  %v1353_v13 = vsel %vm614_vm1, %v1345_v16, 0.0  ;;  %v1319_v60 = vsel %vm614_vm1, %v1307_v48, 0.0 }
 0x23d   : > { %1406 = vadd.xlane.f32.xlu0 %v1405_v33  ;;  %v1272_v14 = vmul.f32 %v1857_v15, %v1271_v45 }
 0x23e   : > { %1412 = vadd.xlane.f32.xlu2 %v1411_v3 }
 0x23f   : > { %v1276_v26 = vsel %vm1275_vm13, %v1857_v15, %v1272_v14  ;;  %vm1446_vm13 = vcmask 1042434  }
 0x240   : > { %v1302_v42 = vmul.f32 %v1276_v26, %v2269_v63  ;;  %v1306_v63 = vmul.f32 %v2412_v38, %v2295_v37  ;;  %v1362_v37 = vsel %vm614_vm1, %v1348_v40, 0.0  ;;  %v1309_v38 = vmul.f32 %v1301_v36, %v2381_v43 }
 0x241   : > { %v1349_v43 = vmul.f32 %v1301_v36, %v2377_v20  ;;  %v1374_v20 = vsel %vm614_vm1, %v2461_v50, 0.0 }
 0x242   : > { %v1390_v2 = vmul.f32 %v1302_v42, %v2437_v5  ;;  %v1316_v5 = vsel %vm614_vm1, %v1306_v63, 0.0  ;;  %v1310_v47 = vmul.f32 %v1302_v42, %v2416_v39  ;;  %v1325_v29 = vsel %vm614_vm1, %v1309_v38, 0.0 }
 0x243   : > { %v1350_v28 = vmul.f32 %v1302_v42, %v2405_v24  ;;  %v1365_v49 = vsel %vm614_vm1, %v1349_v43, 0.0  ;;  %v1311_v24 = vmul.f32 %v2468_v46, %v2342_v9 }
 0x244   : > { %v1408_v34 = vsel %vm614_vm1, %v1390_v2, 0.0  ;;  %v1328_v53 = vsel %vm614_vm1, %v1310_v47, 0.0 }
 0x245   : > { %1314 = vadd.xlane.f32.xlu0 %v1313_v61  ;;  %1409 = vadd.xlane.f32.xlu1 %v1408_v34  ;;  %v1368_v39 = vsel %vm614_vm1, %v1350_v28, 0.0  ;;  %v1331_v8 = vsel %vm614_vm1, %v1311_v24, 0.0 }
 0x246   : > { %1354 = vadd.xlane.f32.xlu2 %v1353_v13 }
 0x24d   : > { %1357 = vadd.xlane.f32.xlu0 %v1356_v41  ;;  %1317 = vadd.xlane.f32.xlu1 %v1316_v5 }
 0x24e   : > { %1320 = vadd.xlane.f32.xlu2 %v1319_v60  ;;  %v2521_v21 = vpop.xlane.xlu2 %851 }
 0x24f   : > { %v2527_v4 = vpop.xlane.xlu0 %854  ;;  %1858 = vrsqrt.f32 %v2521_v21  ;;  %vm890_vm14 = vcmp.eq.f32.partialorder %v2521_v21, inf  ;;  %vm892_vm2 = vcmp.eq.f32.partialorder %v2521_v21, 0.0 }
 0x250   : > { %v2523_v55 = vpop.xlane.xlu1 %848  ;;  %1860 = vrsqrt.f32 %v2527_v4  ;;  %vm902_vm3 = vcmp.eq.f32.partialorder %v2527_v4, inf  ;;  %vm904_vm4 = vcmp.eq.f32.partialorder %v2527_v4, 0.0 }
 0x251   : > { %1862 = vrsqrt.f32 %v2523_v55  ;;  %vm878_vm15 = vcmp.eq.f32.partialorder %v2523_v55, inf  ;;  %vm880_vm0 = vcmp.eq.f32.partialorder %v2523_v55, 0.0 }
 0x255   : > { %1360 = vadd.xlane.f32.xlu0 %v1359_v30  ;;  %1415 = vadd.xlane.f32.xlu1 %v1414_v23  ;;  %v1859_v57 = vpop.eup %1858 }
 0x256   : > { %1363 = vadd.xlane.f32.xlu2 %v1362_v37  ;;  %v1861_v50 = vpop.eup %1860  ;;  %v884_v18 = vmul.f32 %v1859_v57, %v2521_v21 }
 0x257   : > { %v2525_v10 = vpop.xlane.xlu2 %857  ;;  %v1863_v54 = vpop.eup %1862  ;;  %v896_v12 = vmul.f32 %v1861_v50, %v2527_v4 }
 0x258   : > { %v2530_v9 = vpop.xlane.xlu1 %860  ;;  %1864 = vrsqrt.f32 %v2525_v10  ;;  %v872_v62 = vmul.f32 %v1863_v54, %v2523_v55  ;;  %v885_v44 = vmul.f32 %v1859_v57, %v884_v18  ;;  %v905_v18 = vand.u32 2147483648, %v2527_v4 }
 0x259   : > { %1866 = vrsqrt.f32 %v2530_v9  ;;  %v897_v11 = vmul.f32 %v1861_v50, %v896_v12  ;;  %vm914_vm5 = vcmp.eq.f32.partialorder %v2525_v10, inf  ;;  %vm916_vm6 = vcmp.eq.f32.partialorder %v2525_v10, 0.0 }
 0x25a   : > { %v873_v33 = vmul.f32 %v1863_v54, %v872_v62  ;;  %v886_v17 = vmul.f32 0.5, %v885_v44  ;;  %v917_v44 = vand.u32 2147483648, %v2525_v10  ;;  %vm926_vm7 = vcmp.eq.f32.partialorder %v2530_v9, inf }
 0x25b   : > { %v898_v2 = vmul.f32 0.5, %v897_v11  ;;  %vm928_vm8 = vcmp.eq.f32.partialorder %v2530_v9, 0.0 }
 0x25c   : > { %v874_v13 = vmul.f32 0.5, %v873_v33  ;;  %v887_v63 = vsub.f32 1.5, %v886_v17 }
 0x25d   : > { %1326 = vadd.xlane.f32.xlu0 %v1325_v29  ;;  %1323 = vadd.xlane.f32.xlu1 %v1322_v6  ;;  %v899_v5 = vsub.f32 1.5, %v898_v2 }
 0x25e   : > { %1329 = vadd.xlane.f32.xlu2 %v1328_v53  ;;  %v1865_v59 = vpop.eup %1864  ;;  %v875_v40 = vsub.f32 1.5, %v874_v13  ;;  %v888_v23 = vmul.f32 %v1859_v57, %v887_v63  ;;  %v881_v57 = vand.u32 2147483648, %v2523_v55 }
 0x25f   : > { %v2533_v58 = vpop.xlane.xlu2 %863  ;;  %v1867_v31 = vpop.eup %1866  ;;  %v908_v0 = vmul.f32 %v1865_v59, %v2525_v10  ;;  %v900_v25 = vmul.f32 %v1861_v50, %v899_v5 }
 0x260   : > { %1868 = vrsqrt.f32 %v2533_v58  ;;  %v2539_v32 = vpop.xlane.xlu0 %866  ;;  %v2546_v46 = vpop.xlane.xlu1 %869  ;;  %v920_v36 = vmul.f32 %v1867_v31, %v2530_v9  ;;  %v876_v51 = vmul.f32 %v1863_v54, %v875_v40  ;;  %vm938_vm9 = vcmp.eq.f32.partialorder %v2533_v58, inf }
 0x261   : > { %1870 = vrsqrt.f32 %v2539_v32  ;;  %v909_v14 = vmul.f32 %v1865_v59, %v908_v0  ;;  %v901_v22 = vmul.f32 %v900_v25, %v2527_v4  ;;  %v941_v63 = vand.u32 2147483648, %v2533_v58 }
 0x262   : > { %1872 = vrsqrt.f32 %v2546_v46  ;;  %v921_v42 = vmul.f32 %v1867_v31, %v920_v36  ;;  %vm940_vm10 = vcmp.eq.f32.partialorder %v2533_v58, 0.0  ;;  %vm950_vm11 = vcmp.eq.f32.partialorder %v2539_v32, inf }
 0x263   : > { %v910_v56 = vmul.f32 0.5, %v909_v14 }
 0x264   : > { %v922_v48 = vmul.f32 0.5, %v921_v42 }
 0x265   : > { %1369 = vadd.xlane.f32.xlu0 %v1368_v39  ;;  %1366 = vadd.xlane.f32.xlu1 %v1365_v49  ;;  %v911_v30 = vsub.f32 1.5, %v910_v56  ;;  %v2568_v39 = vand.u32 127, %v978_v27  ;;  %v877_v27 = vmul.f32 %v876_v51, %v2523_v55 }
 0x266   : > { %1372 = vadd.xlane.f32.xlu2 %v1371_v7  ;;  %v1869_v35 = vpop.eup %1868  ;;  %v923_v47 = vsub.f32 1.5, %v922_v48  ;;  %v889_v7 = vmul.f32 %v888_v23, %v2521_v21 }
 0x267   : > { %v932_v1 = vmul.f32 %v1869_v35, %v2533_v58  ;;  %v1871_v45 = vpop.eup %1870  ;;  %v912_v43 = vmul.f32 %v1865_v59, %v911_v30 }
 0x268   : > { %v944_v16 = vmul.f32 %v1871_v45, %v2539_v32  ;;  %v2558_v34 = vpop.eup %1872  ;;  %v924_v49 = vmul.f32 %v1867_v31, %v923_v47  ;;  %v891_v59 = vsel %vm890_vm14, %v2521_v21, %v889_v7  ;;  %vm952_vm14 = vcmp.eq.f32.partialorder %v2539_v32, 0.0 }
 0x269   : > { %v933_v61 = vmul.f32 %v1869_v35, %v932_v1  ;;  %v956_v41 = vmul.f32 %v2558_v34, %v2546_v46  ;;  %v913_v50 = vmul.f32 %v912_v43, %v2525_v10  ;;  %v879_v1 = vsel %vm878_vm15, %v2523_v55, %v877_v27  ;;  %v1425_v27 = vld [vmem:[%s2772_s4] sm:$0xf] }
 0x26a   : > { %v945_v60 = vmul.f32 %v1871_v45, %v944_v16  ;;  %v925_v31 = vmul.f32 %v924_v49, %v2530_v9  ;;  %vm1448_vm15 = vcmask 1043459  }
 0x26b   : > { %v934_v19 = vmul.f32 0.5, %v933_v61  ;;  %v957_v28 = vmul.f32 %v2558_v34, %v956_v41  ;;  %v915_v11 = vsel %vm914_vm5, %v2525_v10, %v913_v50  ;;  %vm1454_vm5 = vcmask 1046534  }
 0x26c   : > { %v946_v53 = vmul.f32 0.5, %v945_v60  ;;  %v927_v42 = vsel %vm926_vm7, %v2530_v9, %v925_v31  ;;  %v2623_v56 = vsel %vm916_vm6, %v917_v44, %v915_v11  ;;  %vm1456_vm6 = vcmask 1047559  }
 0x26d   : > { %1335 = vadd.xlane.f32.xlu0 %v1334_v52  ;;  %1332 = vadd.xlane.f32.xlu1 %v1331_v8  ;;  %v935_v6 = vsub.f32 1.5, %v934_v19  ;;  %v958_v8 = vmul.f32 0.5, %v957_v28  ;;  %v953_v19 = vand.u32 2147483648, %v2539_v32  ;;  %v965_v28 = vand.u32 2147483648, %v2546_v46 }
 0x26e   : > { %v947_v24 = vsub.f32 1.5, %v946_v53  ;;  %vm1458_vm7 = vcmask 31744  }
 0x26f   : > { %v936_v52 = vmul.f32 %v1869_v35, %v935_v6  ;;  %v903_v35 = vsel %vm902_vm3, %v2527_v4, %v901_v22  ;;  %v959_v36 = vsub.f32 1.5, %v958_v8  ;;  %vm1452_vm3 = vcmask 1045509  }
 0x270   : > { %v948_v62 = vmul.f32 %v1871_v45, %v947_v24  ;;  %v929_v45 = vand.u32 2147483648, %v2530_v9  ;;  %v2607_v17 = vsel %vm904_vm4, %v905_v18, %v903_v35  ;;  %vm964_vm4 = vcmp.eq.f32.partialorder %v2546_v46, 0.0 }
 0x271   : > { %v937_v0 = vmul.f32 %v936_v52, %v2533_v58  ;;  %v960_v13 = vmul.f32 %v2558_v34, %v959_v36 }
 0x272   : > { %v949_v2 = vmul.f32 %v948_v62, %v2539_v32  ;;  %v2632_v34 = vsel %vm928_vm8, %v929_v45, %v927_v42 }
 0x273   : > { %v939_v61 = vsel %vm938_vm9, %v2533_v58, %v937_v0  ;;  %v961_v9 = vmul.f32 %v960_v13, %v2546_v46 }
 0x274   : > { %v2638_v41 = vsel %vm940_vm10, %v941_v63, %v939_v61  ;;  %v951_v60 = vsel %vm950_vm11, %v2539_v32, %v949_v2 }
 0x275   : > { %1375 = vadd.xlane.f32.xlu1 %v1374_v20  ;;  %v893_v20 = vand.u32 2147483648, %v2521_v21  ;;  %v2618_v21 = vsel %vm880_vm0, %v881_v57, %v879_v1  ;;  %vm962_vm0 = vcmp.eq.f32.partialorder %v2546_v46, inf }
 0x276   : > { %v963_v53 = vsel %vm962_vm0, %v2546_v46, %v961_v9 }
 0x277   : > { %v2603_v14 = vsel %vm892_vm2, %v893_v20, %v891_v59  ;;  %vm1450_vm2 = vcmask 1044484   ;;  %v2663_v49 = vsel %vm964_vm4, %v965_v28, %v963_v53 }
 0x27b   : > { %v2543_v15 = vpop.xlane.xlu2 %1394 }
 0x298   : > { %v2553_v3 = vpop.xlane.xlu0 %1397 }
 0x299   : > { %v1418_v16 = vmul.f32 %v2553_v3, %v2603_v14  ;;  %v1417_v3 = vmul.f32 %v2543_v15, %v2618_v21 }
 0x29b   : > { %v1541_v15 = vperm.slane %v1418_v16, %v2568_v39  ;;  %v1540_v40 = vperm.slane %v1417_v3, %v2568_v39 }
 0x2a0   : > { %v1401_v38 = vpop.xlane.xlu1 %1400 }
 0x2a1   : > { %v1419_v4 = vmul.f32 %v1401_v38, %v2607_v17  ;;  %v1548_v38 = vsel %vm1444_vm12, %v1541_v15, %v1540_v40 }
 0x2a3   : > { %v1542_v58 = vperm.slane %v1419_v4, %v2568_v39 }
 0x2a5   : > { %v1549_v6 = vsel %vm1446_vm13, %v1542_v58, %v1548_v38 }
 0x2a9   : > { %v2555_v26 = vpop.xlane.xlu2 %1403 }
 0x2aa   : > { %v1420_v48 = vmul.f32 %v2555_v26, %v2623_v56 }
 0x2ac   : > { %v1543_v30 = vperm.slane %v1420_v48, %v2568_v39 }
 0x2ae   : > { %v1550_v51 = vsel %vm1448_vm15, %v1543_v30, %v1549_v6 }
 0x2b0   : > { %v2562_v37 = vpop.xlane.xlu0 %1406 }
 0x2b1   : > { %v2564_v29 = vpop.xlane.xlu2 %1412  ;;  %v1421_v10 = vmul.f32 %v2562_v37, %v2632_v34  ;;  %v2649_v37 = vsel %vm952_vm14, %v953_v19, %v951_v60 }
 0x2b2   : > { %v1423_v32 = vmul.f32 %v2564_v29, %v2649_v37 }
 0x2b3   : > { %v1544_v23 = vperm.slane %v1421_v10, %v2568_v39 }
 0x2b4   : > { %v1546_v29 = vperm.slane %v1423_v32, %v2568_v39 }
 0x2b5   : > { %v1551_v7 = vsel %vm1450_vm2, %v1544_v23, %v1550_v51 }
 0x2b8   : > { %v2581_v54 = vpop.xlane.xlu0 %1314  ;;  %v1410_v12 = vpop.xlane.xlu1 %1409 }
 0x2b9   : > { %v2599_v33 = vpop.xlane.xlu2 %1354  ;;  %v1422_v26 = vmul.f32 %v1410_v12, %v2638_v41  ;;  %v1337_v31 = vmul.f32 %v2581_v54, %v2618_v21 }
 0x2ba   : > { %v1377_v11 = vmul.f32 %v2599_v33, %v2618_v21 }
 0x2bb   : > { %v1545_v47 = vperm.slane %v1422_v26, %v2568_v39  ;;  %v1436_v36 = vperm.slane %v1337_v31, %v2568_v39 }
 0x2bc   : > { %v1493_v4 = vperm.slane %v1377_v11, %v2568_v39 }
 0x2bd   : > { %v1552_v52 = vsel %vm1452_vm3, %v1545_v47, %v1551_v7 }
 0x2be   : > { %v1553_v20 = vsel %vm1454_vm5, %v1546_v29, %v1552_v52 }
 0x2c0   : > { %v1358_v55 = vpop.xlane.xlu0 %1357  ;;  %v1318_v5 = vpop.xlane.xlu1 %1317 }
 0x2c1   : > { %v1321_v25 = vpop.xlane.xlu2 %1320  ;;  %v1338_v18 = vmul.f32 %v1318_v5, %v2603_v14  ;;  %v1378_v44 = vmul.f32 %v1358_v55, %v2603_v14 }
 0x2c2   : > { %v1339_v12 = vmul.f32 %v1321_v25, %v2607_v17 }
 0x2c3   : > { %v1437_v35 = vperm.slane %v1338_v18, %v2568_v39  ;;  %v1494_v13 = vperm.slane %v1378_v44, %v2568_v39 }
 0x2c4   : > { %v1438_v45 = vperm.slane %v1339_v12, %v2568_v39 }
 0x2c5   : > { %v1445_v16 = vsel %vm1444_vm12, %v1437_v35, %v1436_v36  ;;  %v1501_v10 = vsel %vm1444_vm12, %v1494_v13, %v1493_v4 }
 0x2c6   : > { %v1447_v14 = vsel %vm1446_vm13, %v1438_v45, %v1445_v16 }
 0x2c8   : > { %v1361_v43 = vpop.xlane.xlu0 %1360  ;;  %v1416_v22 = vpop.xlane.xlu1 %1415 }
 0x2c9   : > { %v1424_v24 = vmul.f32 %v1416_v22, %v2663_v49  ;;  %v1364_v57 = vpop.xlane.xlu2 %1363  ;;  %v1379_v2 = vmul.f32 %v1361_v43, %v2607_v17 }
 0x2ca   : > { %v1380_v63 = vmul.f32 %v1364_v57, %v2623_v56 }
 0x2cb   : > { %v1547_v8 = vperm.slane %v1424_v24, %v2568_v39  ;;  %v1495_v21 = vperm.slane %v1379_v2, %v2568_v39 }
 0x2cc   : > { %v1496_v60 = vperm.slane %v1380_v63, %v2568_v39 }
 0x2cd   : > { %v1554_v46 = vsel %vm1456_vm6, %v1547_v8, %v1553_v20  ;;  %v1502_v58 = vsel %vm1446_vm13, %v1495_v21, %v1501_v10 }
 0x2ce   : > { %1738 = vmatpush.xpose.msk.msra.mxu2 %vm1458_vm7, %v1554_v46  ;;  %v1503_v47 = vsel %vm1448_vm15, %v1496_v60, %v1502_v58 }
 0x2d0   : > { %v1327_v50 = vpop.xlane.xlu0 %1326  ;;  %v1324_v59 = vpop.xlane.xlu1 %1323 }
 0x2d1   : > { %1739 = vmatmul.msk.f32.vlgmr.msra.gmra.mxu2 %vm1458_vm7, %v1425_v27  ;;  %v1340_v62 = vmul.f32 %v1324_v59, %v2623_v56  ;;  %v1330_v42 = vpop.xlane.xlu2 %1329  ;;  %v1341_v54 = vmul.f32 %v1327_v50, %v2632_v34 }
 0x2d2   : > { %v1342_v3 = vmul.f32 %v1330_v42, %v2638_v41 }
 0x2d3   : > { %v1439_v61 = vperm.slane %v1340_v62, %v2568_v39  ;;  %v1440_v33 = vperm.slane %v1341_v54, %v2568_v39 }
 0x2d4   : > { %v1441_v19 = vperm.slane %v1342_v3, %v2568_v39 }
 0x2d5   : > { %v1449_v48 = vsel %vm1448_vm15, %v1439_v61, %v1447_v14 }
 0x2d6   : > { %v1451_v56 = vsel %vm1450_vm2, %v1440_v33, %v1449_v48 }
 0x2d7   : > { %v1453_v38 = vsel %vm1452_vm3, %v1441_v19, %v1451_v56 }
 0x2d8   : > { %v1370_v0 = vpop.xlane.xlu0 %1369  ;;  %v1367_v1 = vpop.xlane.xlu1 %1366 }
 0x2d9   : > { %v1381_v17 = vmul.f32 %v1367_v1, %v2632_v34  ;;  %v1382_v26 = vmul.f32 %v1370_v0, %v2638_v41  ;;  %v1373_v30 = vpop.xlane.xlu2 %1372 }
 0x2da   : > { %v1383_v53 = vmul.f32 %v1373_v30, %v2649_v37 }
 0x2db   : > { %v1497_v34 = vperm.slane %v1381_v17, %v2568_v39  ;;  %v1498_v25 = vperm.slane %v1382_v26, %v2568_v39 }
 0x2dc   : > { %v1499_v7 = vperm.slane %v1383_v53, %v2568_v39 }
 0x2dd   : > { %v1504_v6 = vsel %vm1450_vm2, %v1497_v34, %v1503_v47 }
 0x2de   : > { %v1505_v43 = vsel %vm1452_vm3, %v1498_v25, %v1504_v6 }
 0x2e0   : > { %v1336_v55 = vpop.xlane.xlu0 %1335  ;;  %v1333_v5 = vpop.xlane.xlu1 %1332 }
 0x2e1   : > { %v1344_v15 = vmul.f32 %v1336_v55, %v2663_v49  ;;  %v1343_v9 = vmul.f32 %v1333_v5, %v2649_v37  ;;  %v1506_v37 = vsel %vm1454_vm5, %v1499_v7, %v1505_v43 }
 0x2e3   : > { %v1443_v40 = vperm.slane %v1344_v15, %v2568_v39  ;;  %v1442_v23 = vperm.slane %v1343_v9, %v2568_v39 }
 0x2e5   : > { %v1455_v41 = vsel %vm1454_vm5, %v1442_v23, %v1453_v38 }
 0x2e6   : > { %v1457_v32 = vsel %vm1456_vm6, %v1443_v40, %v1455_v41 }
 0x2e7   : > { %1733 = vmatpush.xpose.msk.msra.mxu0 %vm1458_vm7, %v1457_v32 }
 0x2e8   : > { %v1376_v28 = vpop.xlane.xlu1 %1375 }
 0x2e9   : > { %v1384_v51 = vmul.f32 %v1376_v28, %v2663_v49 }
 0x2ea   : > { %1734 = vmatmul.msk.f32.vlgmr.msra.gmra.mxu0 %vm1458_vm7, %v1425_v27 }
 0x2eb   : > { %v1500_v22 = vperm.slane %v1384_v51, %v2568_v39 }
 0x2ed   : > { %v1507_v24 = vsel %vm1456_vm6, %v1500_v22, %v1506_v37 }
 0x2ee   : > { %1735 = vmatpush.xpose.msk.msra.mxu1 %vm1458_vm7, %v1507_v24 }
 0x2f1   : > { %1736 = vmatmul.msk.f32.vlgmr.msra.gmra.mxu1 %vm1458_vm7, %v1425_v27 }
 0x354   : > { %v1574_v52 = vpop.f32.mrf.mxu2 }
 0x355   : > { %1740 = vst.msk [vmem:[%s301_s13 + $0x8] sm:$0xf] %vm614_vm1, %v1574_v52 }
 0x367   : > { %v1481_v49 = vpop.f32.mrf.mxu0 }
 0x368   : > { %1484 = vst.msk [vmem:[%s301_s13] sm:$0xf] %vm614_vm1, %v1481_v49 }
 0x36e   : > { %v1527_v39 = vpop.f32.mrf.mxu1 }
 0x36f   : > { %1737 = vst.msk [vmem:[%s301_s13 + $0x4] sm:$0xf] %vm614_vm1, %v1527_v39 }
 0x370   : > { %1901 = shalt.err (!%p1898_p5)
}
 0x371   : > { %s1954_s11 = smov 64   ;;  %s1955_s13 = smov 4  }
 0x372   : > { %1749 = dma.vmem_to_hbm [thread:$0]  (%p2026_p4), %s1594_s24, 192, %s1596_s25, %s1580_s27, %s1954_s11, %s1954_s11, %s1955_s13  }
 0x373 PF: > { %p1755_p6 = scmp.ge.s32.totalorder %s1952_s23, 2  ;;  %s1610_s14 = sand.u32 1, %s1932_s18  }
 0x374   : > { %s1611_s15 = scalar_lea.sflag [#allocation3], %s1610_s14 }
 0x375   : > { %p1752_p7 = pnand %p1755_p6, %p2033_p8 }
 0x377   : > { %p1753_p9 = pneg %p1752_p7 }
 0x379   : > { %1927 = dma.done.wait (%p1753_p9), %s1611_s15, 192  }
 0x37a   : > { %1929 = vsyncadd (%p1753_p9), %s1611_s15, 4294967104  ;;  %s18_s23 = sadd.s32 1, %s1952_s23   ;;  %s2784_s18 = smov %s1936_s19 }
 0x37b   : > { %p15_p10 = scmp.ge.s32.totalorder %s18_s23, 4   ;;  %s2785_s19 = smov %s1940_s20 }
 0x37c   : > { %s2786_s20 = smov %s2039_s6  ;;  %s2787_s21 = smov %s1948_s22 }
 0x37d   : > { %s2788_s22 = smov %s2790_s26  ;;  %17 = sbr.rel (!%p15_p10) target bundleno = 4 (0x4), region = 90 }
 0x382   :  { %1617 = vsyncpa [#allocation3], 1 }
 0x383   :  { %1619 = vsyncpa [#allocation3 + $0x1], 1 }

</bundles_post_ra>
